<compile_context>
chip_gen: v7x
topology: tpu7x:2x2x1
jax: 0.10.0
libtpu: 0.0.40
codegen_flags: <defaults>
</compile_context>

<pallas_src>
import functools

import jax
import jax.numpy as jnp
from jax.experimental import pallas as pl
from jax.experimental.pallas import tpu as pltpu


def _round_up(x, m):
    return ((x + m - 1) // m) * m


def _make_kernel(*, K, P, TH, W, cin, cout, flatten_out, res_kind, activation):
    """Kernel computing one (TH, W, cout) output row tile per grid step."""
    CC = K * K * cin  # im2col contraction width

    def kernel(x_ref, w_ref, b_ref, *rest):
        if res_kind == "dot":
            rmat_ref, o_ref = rest
        else:
            (o_ref,) = rest

        h0 = pl.multiple_of(pl.program_id(1) * TH, 8)

        # Halo'd row slab for this tile: (TH + 2P, W + 2P, cin).
        slab = x_ref[0, pl.ds(h0, TH + 2 * P)]

        # kw-shifted windows, built once per tile and reused for every kh tap and
        # for the residual center window.
        shifted = [slab[:, kw:kw + W, :] for kw in range(K)]       # K x (TH+2P, W, cin)
        s_kw = jnp.concatenate(shifted, axis=-1)                   # (TH+2P, W, K*cin)
        # kh-shifted row slices -> full im2col patch matrix (single MXU pass).
        s_all = jnp.concatenate([s_kw[kh:kh + TH] for kh in range(K)], axis=-1)
        lhs = s_all.reshape(TH * W, CC)                            # (TH*W, K*K*cin)

        y = jnp.dot(lhs, w_ref[...], preferred_element_type=jnp.float32)
        y = y + b_ref[...]                                         # bias broadcast

        if activation == "relu":
            y = jnp.maximum(y, 0.0)
        # activation is None otherwise.

        # Residual that could not be folded into the conv weight (activation != None).
        if res_kind != "none":
            r = shifted[P][P:P + TH].reshape(TH * W, cin)          # center window, reused
            if res_kind == "dot":
                # 'add' channel tiling/folding (0/1 matrix) or 'map' 1x1 conv.
                y = y + jnp.dot(r, rmat_ref[...],
                                preferred_element_type=jnp.float32)
            else:  # "plain": residual_mode != 'add' and cin == cout
                y = y + r.astype(jnp.float32)
        # res_kind == "none": residual already folded, or 'add' with cin == cout
        # which adds nothing (PyTorch quirk).

        y3 = y.reshape(TH, W, cout)
        if flatten_out:
            # Lane-dense store: (TH, W*cout) with W*cout % 128 == 0.
            flat = jnp.concatenate([y3[:, w] for w in range(W)], axis=-1)
            o_ref[0] = flat.astype(o_ref.dtype)
        else:
            o_ref[0] = y3.astype(o_ref.dtype)

    return kernel


@functools.partial(jax.jit, static_argnames=(
    "num_in", "num_out", "kernel_size", "residual", "activation", "compute_dtype"))
def resconv_forward(x_nchw, params, *, num_in, num_out, kernel_size=3,
                    residual="add", activation=None, compute_dtype=jnp.bfloat16):
    """Pallas implementation of ResConv.forward (groups=1, transpose=False)."""
    B, C, H, W = x_nchw.shape
    assert C == num_in
    K = kernel_size
    P = K // 2

    # --- residual bookkeeping (mirrors the PyTorch forward) ---
    has_map = (residual == "map") and (num_in != num_out)
    has_rmat = has_map or (residual == "add" and num_in != num_out)
    needs_plain = (residual != "add") and not has_map
    if needs_plain:
        assert num_in == num_out, "plain residual add requires num_in == num_out"

    # Residual channel-map matrix (f32, (cin, cout)) when the residual is linear in x.
    rmat = None
    if has_rmat:
        if has_map:
            rmat = jnp.transpose(params["w_res"][:, :, 0, 0], (1, 0)).astype(jnp.float32)
        else:
            ci = jnp.arange(num_in)[:, None]
            co = jnp.arange(num_out)[None, :]
            if num_in < num_out:   # tile r channels onto y in chunks of num_in
                rmat = (ci == (co % num_in)).astype(jnp.float32)
            else:                  # fold r channels onto y in chunks of num_out
                rmat = ((ci % num_out) == co).astype(jnp.float32)
    elif needs_plain and activation is None:
        rmat = jnp.eye(num_in, num_out, dtype=jnp.float32)

    # Conv weight: OIHW -> (kh, kw, cin, cout) -> (K*K*cin, cout) im2col matrix.
    w_flat = jnp.transpose(params["w"], (2, 3, 1, 0)).astype(jnp.float32)
    w_flat = w_flat.reshape(K * K * num_in, num_out)

    # With no activation, the residual add commutes with the conv: fold the residual
    # channel map onto the center tap of the conv weight (removes a matmul + input).
    fold_residual = (rmat is not None) and (activation is None)
    if fold_residual:
        center = (P * K + P) * num_in
        w_flat = w_flat.at[center:center + num_in, :].add(rmat)
        res_kind = "none"
    elif has_rmat:
        res_kind = "dot"
    elif needs_plain:
        res_kind = "plain"
    else:
        res_kind = "none"   # 'add' with cin == cout adds nothing (PyTorch quirk)

    # --- tile geometry ---
    # Pad W to a multiple of 8 (sublane alignment), H to a multiple of the row tile
    # TH; aim for TH*W >= 256 rows in the MXU M dimension.
    Wt = _round_up(W, 8)
    TH = _round_up(max(8, 256 // Wt), 8)
    TH = min(TH, _round_up(H, 8))
    Ht = _round_up(H, TH)
    HT = Ht // TH

    cdtype = jnp.dtype(compute_dtype)
    out_dtype = x_nchw.dtype

    # Lane-dense output path: flatten (W, cout) into one >=128-wide lane dim.
    flatten_out = (num_out % 128 != 0) and ((Wt * num_out) % 128 == 0) and (Wt <= 128)

    # glue: NCHW -> NHWC, compute-dtype cast, conv zero padding (+ tile padding).
    x_nhwc = jnp.transpose(x_nchw, (0, 2, 3, 1)).astype(cdtype)
    x_pad = jnp.pad(x_nhwc, ((0, 0), (P, P + (Ht - H)), (P, P + (Wt - W)), (0, 0)))

    w_in = w_flat.astype(cdtype)
    b = params["b"].astype(jnp.float32).reshape(1, num_out)

    Hp, Wp = Ht + 2 * P, Wt + 2 * P
    inputs = [x_pad, w_in, b]
    in_specs = [
        pl.BlockSpec((1, Hp, Wp, num_in), lambda bb, hh: (bb, 0, 0, 0)),
        pl.BlockSpec((K * K * num_in, num_out), lambda bb, hh: (0, 0)),
        pl.BlockSpec((1, num_out), lambda bb, hh: (0, 0)),
    ]
    if res_kind == "dot":
        inputs.append(rmat.astype(cdtype))
        in_specs.append(pl.BlockSpec((num_in, num_out), lambda bb, hh: (0, 0)))

    if flatten_out:
        out_shape = jax.ShapeDtypeStruct((B, Ht, Wt * num_out), out_dtype)
        out_spec = pl.BlockSpec((1, TH, Wt * num_out), lambda bb, hh: (bb, hh, 0))
    else:
        out_shape = jax.ShapeDtypeStruct((B, Ht, Wt, num_out), out_dtype)
        out_spec = pl.BlockSpec((1, TH, Wt, num_out), lambda bb, hh: (bb, hh, 0, 0))

    kernel = _make_kernel(K=K, P=P, TH=TH, W=Wt, cin=num_in, cout=num_out,
                          flatten_out=flatten_out, res_kind=res_kind,
                          activation=activation)

    # Compiler hints: VMEM budget and cost estimate.
    isz = cdtype.itemsize
    osz = jnp.dtype(out_dtype).itemsize
    x_blk = Hp * Wp * num_in * isz
    w_blk = K * K * num_in * num_out * isz + num_out * 4 + num_in * num_out * isz
    o_blk = TH * Wt * num_out * osz
    tmp = ((TH + 2 * P) * Wt * num_in * (2 * K + K * K) * isz
           + 3 * TH * Wt * num_out * 4)
    vmem_est = 2 * (x_blk + w_blk + o_blk) + tmp
    vmem_limit = int(min(max(2 * vmem_est, 32 * 1024 * 1024), 100 * 1024 * 1024))

    flops = 2 * B * Ht * Wt * K * K * num_in * num_out
    bytes_accessed = int(x_pad.size * isz + w_flat.size * isz
                         + B * Ht * Wt * num_out * osz)

    out = pl.pallas_call(
        kernel,
        out_shape=out_shape,
        grid=(B, HT),
        in_specs=in_specs,
        out_specs=out_spec,
        compiler_params=pltpu.CompilerParams(
            dimension_semantics=("parallel", "parallel"),
            vmem_limit_bytes=vmem_limit),
        cost_estimate=pl.CostEstimate(flops=flops, transcendentals=0,
                                      bytes_accessed=bytes_accessed),
    )(*inputs)

    if flatten_out:
        out = out.reshape(B, Ht, Wt, num_out)
    out = out[:, :H, :W, :]
    return jnp.transpose(out, (0, 3, 1, 2))                           # back to NCHW


def resconv_reference(x, w, b, w_res=None, *, num_in, num_out, kernel_size=3,
                      residual="add", activation=None):
    """Pure-JAX reference mirroring the PyTorch forward."""
    P = kernel_size // 2
    hi = jax.lax.Precision.HIGHEST
    dn = ("NCHW", "OIHW", "NCHW")
    y = jax.lax.conv_general_dilated(
        x, w, (1, 1), [(P, P), (P, P)], dimension_numbers=dn, precision=hi)
    y = y + b[None, :, None, None]
    if activation == "relu":
        y = jnp.maximum(y, 0.0)
    r = x
    if residual == "map" and num_in != num_out:
        r = jax.lax.conv_general_dilated(
            r, w_res, (1, 1), "VALID", dimension_numbers=dn, precision=hi)
    if residual == "add":
        if num_in < num_out:
            idx = 0
            while idx < num_out:
                idx2 = min(idx + num_in, num_out)
                n = idx2 - idx
                y = y.at[:, idx:idx2].add(r[:, :n])
                idx += num_in
        elif num_in > num_out:
            idx = 0
            while idx < num_in:
                idx2 = min(idx + num_out, num_in)
                n = idx2 - idx
                y = y.at[:, :n].add(r[:, idx:idx2])
                idx += num_out
        # num_in == num_out: nothing added (matches PyTorch code)
    else:
        y = y + r
    return y


if __name__ == "__main__":
    key = jax.random.PRNGKey(0)
    B, Cin, Cout, H, W, K = 2, 4, 8, 16, 16, 3
    k1, k2, k3, k4, k5, k6 = jax.random.split(key, 6)

    x = jax.random.normal(k1, (B, Cin, H, W), dtype=jnp.float32)
    w = jax.random.normal(k2, (Cout, Cin, K, K), dtype=jnp.float32) * 0.1
    b = jax.random.normal(k3, (Cout,), dtype=jnp.float32) * 0.1
    params = {"w": w, "b": b}

    # 1) f32 compute, 'add' residual (cin < cout), relu, lane-dense store path.
    y = jax.block_until_ready(
        resconv_forward(x, params, num_in=Cin, num_out=Cout, kernel_size=K,
                        residual="add", activation="relu",
                        compute_dtype=jnp.float32))
    y_ref = resconv_reference(x, w, b, num_in=Cin, num_out=Cout, kernel_size=K,
                              residual="add", activation="relu")
    assert y.shape == (B, Cout, H, W), y.shape
    err = float(jnp.max(jnp.abs(y - y_ref)))
    assert err < 5e-2, f"f32 add-path max abs error {err}"

    # 2) bf16 compute (default), same config, looser tolerance.
    y16 = jax.block_until_ready(
        resconv_forward(x, params, num_in=Cin, num_out=Cout, kernel_size=K,
                        residual="add", activation="relu"))
    err16 = float(jnp.max(jnp.abs(y16 - y_ref)))
    assert err16 < 1e-1, f"bf16 add-path max abs error {err16}"

    # 3) 'map' residual (1x1 conv, folded into the conv weight), f32.
    w_res = jax.random.normal(k4, (Cout, Cin, 1, 1), dtype=jnp.float32) * 0.1
    ym = jax.block_until_ready(
        resconv_forward(x, {"w": w, "b": b, "w_res": w_res},
                        num_in=Cin, num_out=Cout, kernel_size=K,
                        residual="map", activation=None,
                        compute_dtype=jnp.float32))
    ym_ref = resconv_reference(x, w, b, w_res, num_in=Cin, num_out=Cout,
                               kernel_size=K, residual="map", activation=None)
    errm = float(jnp.max(jnp.abs(ym - ym_ref)))
    assert errm < 5e-2, f"map-path max abs error {errm}"

    # 4) 'add' residual with cin > cout (channel fold), f32, non-flattened store path.
    Cin2, Cout2 = 8, 4
    x2 = jax.random.normal(k5, (B, Cin2, H, W), dtype=jnp.float32)
    w2 = jax.random.normal(k6, (Cout2, Cin2, K, K), dtype=jnp.float32) * 0.1
    b2 = jnp.zeros((Cout2,), jnp.float32)
    y2 = jax.block_until_ready(
        resconv_forward(x2, {"w": w2, "b": b2}, num_in=Cin2, num_out=Cout2,
                        kernel_size=K, residual="add", activation=None,
                        compute_dtype=jnp.float32))
    y2_ref = resconv_reference(x2, w2, b2, num_in=Cin2, num_out=Cout2,
                               kernel_size=K, residual="add", activation=None)
    err2 = float(jnp.max(jnp.abs(y2 - y2_ref)))
    assert err2 < 5e-2, f"f32 fold-path max abs error {err2}"

    print("KERNEL_OK")
</pallas_src>

<mosaic_0001>
module attributes {stable_mosaic.version = 11 : i64} {
  func.func @kernel(%arg0: i32, %arg1: i32, %arg2: memref<1x18x18x4xf32, #tpu.memory_space<vmem>>, %arg3: memref<36x8xf32, #tpu.memory_space<vmem>>, %arg4: memref<1x8xf32, #tpu.memory_space<vmem>>, %arg5: memref<4x8xf32, #tpu.memory_space<vmem>>, %arg6: memref<1x16x128xf32, #tpu.memory_space<vmem>>) attributes {dimension_semantics = [#tpu.dimension_semantics<parallel>, #tpu.dimension_semantics<parallel>], iteration_bounds = array<i64: 2, 1>, scalar_prefetch = 0 : i64, scratch_operands = 0 : i64, tpu.core_type = #tpu.core_type<tc>, window_params = [{transform_indices = @transform_0, window_bounds = array<i64: 1, 18, 18, 4>}, {pipeline_mode = #tpu.pipeline_mode<synchronous>, transform_indices = @transform_1, window_bounds = array<i64: 36, 8>}, {pipeline_mode = #tpu.pipeline_mode<synchronous>, transform_indices = @transform_2, window_bounds = array<i64: 1, 8>}, {pipeline_mode = #tpu.pipeline_mode<synchronous>, transform_indices = @transform_3, window_bounds = array<i64: 4, 8>}, {transform_indices = @transform_4, window_bounds = array<i64: 1, 16, 128>}]} {
    %c16_i32 = arith.constant 16 : i32
    %0 = arith.muli %arg1, %c16_i32 : i32
    %1 = tpu.assume_multiple %0, 8 : i32
    %c0 = arith.constant 0 : index
    %2 = arith.index_cast %1 : i32 to index
    %c0_0 = arith.constant 0 : index
    %c0_1 = arith.constant 0 : index
    %3 = vector.load %arg2[%c0, %2, %c0_0, %c0_1] : memref<1x18x18x4xf32, #tpu.memory_space<vmem>>, vector<1x18x18x4xf32>
    %4 = vector.shape_cast %3 : vector<1x18x18x4xf32> to vector<18x18x4xf32>
    %5 = vector.extract_strided_slice %4 {offsets = [0, 0, 0], sizes = [18, 16, 4], strides = [1, 1, 1]} : vector<18x18x4xf32> to vector<18x16x4xf32>
    %6 = vector.extract_strided_slice %4 {offsets = [0, 1, 0], sizes = [18, 16, 4], strides = [1, 1, 1]} : vector<18x18x4xf32> to vector<18x16x4xf32>
    %7 = vector.extract_strided_slice %4 {offsets = [0, 2, 0], sizes = [18, 16, 4], strides = [1, 1, 1]} : vector<18x18x4xf32> to vector<18x16x4xf32>
    %8 = tpu.concatenate %5, %6, %7 in 2 : vector<18x16x4xf32>, vector<18x16x4xf32>, vector<18x16x4xf32> -> vector<18x16x12xf32>
    %9 = vector.extract_strided_slice %8 {offsets = [0, 0, 0], sizes = [16, 16, 12], strides = [1, 1, 1]} : vector<18x16x12xf32> to vector<16x16x12xf32>
    %10 = vector.extract_strided_slice %8 {offsets = [1, 0, 0], sizes = [16, 16, 12], strides = [1, 1, 1]} : vector<18x16x12xf32> to vector<16x16x12xf32>
    %11 = vector.extract_strided_slice %8 {offsets = [2, 0, 0], sizes = [16, 16, 12], strides = [1, 1, 1]} : vector<18x16x12xf32> to vector<16x16x12xf32>
    %12 = tpu.concatenate %9, %10, %11 in 2 : vector<16x16x12xf32>, vector<16x16x12xf32>, vector<16x16x12xf32> -> vector<16x16x36xf32>
    %13 = vector.shape_cast %12 : vector<16x16x36xf32> to vector<256x36xf32>
    %c0_2 = arith.constant 0 : index
    %c0_3 = arith.constant 0 : index
    %14 = vector.load %arg3[%c0_2, %c0_3] : memref<36x8xf32, #tpu.memory_space<vmem>>, vector<36x8xf32>
    %cst = arith.constant dense<0.000000e+00> : vector<256x8xf32>
    %15 = tpu.matmul %13, %14, %cst {dimension_numbers = #tpu.dot_dimension_numbers<[1], [0], [0], [1], [0, 0, 1, 1], [], []>} : vector<256x36xf32>, vector<36x8xf32>, vector<256x8xf32> -> vector<256x8xf32>
    %c0_4 = arith.constant 0 : index
    %c0_5 = arith.constant 0 : index
    %16 = vector.load %arg4[%c0_4, %c0_5] : memref<1x8xf32, #tpu.memory_space<vmem>>, vector<1x8xf32>
    %17 = vector.broadcast %16 : vector<1x8xf32> to vector<256x8xf32>
    %18 = arith.addf %15, %17 : vector<256x8xf32>
    %cst_6 = arith.constant 0.000000e+00 : f32
    %19 = vector.broadcast %cst_6 : f32 to vector<256x8xf32>
    %20 = arith.maximumf %18, %19 : vector<256x8xf32>
    %21 = vector.extract_strided_slice %6 {offsets = [1, 0, 0], sizes = [16, 16, 4], strides = [1, 1, 1]} : vector<18x16x4xf32> to vector<16x16x4xf32>
    %22 = vector.shape_cast %21 : vector<16x16x4xf32> to vector<256x4xf32>
    %c0_7 = arith.constant 0 : index
    %c0_8 = arith.constant 0 : index
    %23 = vector.load %arg5[%c0_7, %c0_8] : memref<4x8xf32, #tpu.memory_space<vmem>>, vector<4x8xf32>
    %cst_9 = arith.constant dense<0.000000e+00> : vector<256x8xf32>
    %24 = tpu.matmul %22, %23, %cst_9 {dimension_numbers = #tpu.dot_dimension_numbers<[1], [0], [0], [1], [0, 0, 1, 1], [], []>} : vector<256x4xf32>, vector<4x8xf32>, vector<256x8xf32> -> vector<256x8xf32>
    %25 = arith.addf %20, %24 : vector<256x8xf32>
    %26 = vector.shape_cast %25 : vector<256x8xf32> to vector<16x16x8xf32>
    %27 = vector.extract_strided_slice %26 {offsets = [0, 0, 0], sizes = [16, 1, 8], strides = [1, 1, 1]} : vector<16x16x8xf32> to vector<16x1x8xf32>
    %28 = vector.shape_cast %27 : vector<16x1x8xf32> to vector<16x8xf32>
    %29 = vector.extract_strided_slice %26 {offsets = [0, 1, 0], sizes = [16, 1, 8], strides = [1, 1, 1]} : vector<16x16x8xf32> to vector<16x1x8xf32>
    %30 = vector.shape_cast %29 : vector<16x1x8xf32> to vector<16x8xf32>
    %31 = vector.extract_strided_slice %26 {offsets = [0, 2, 0], sizes = [16, 1, 8], strides = [1, 1, 1]} : vector<16x16x8xf32> to vector<16x1x8xf32>
    %32 = vector.shape_cast %31 : vector<16x1x8xf32> to vector<16x8xf32>
    %33 = vector.extract_strided_slice %26 {offsets = [0, 3, 0], sizes = [16, 1, 8], strides = [1, 1, 1]} : vector<16x16x8xf32> to vector<16x1x8xf32>
    %34 = vector.shape_cast %33 : vector<16x1x8xf32> to vector<16x8xf32>
    %35 = vector.extract_strided_slice %26 {offsets = [0, 4, 0], sizes = [16, 1, 8], strides = [1, 1, 1]} : vector<16x16x8xf32> to vector<16x1x8xf32>
    %36 = vector.shape_cast %35 : vector<16x1x8xf32> to vector<16x8xf32>
    %37 = vector.extract_strided_slice %26 {offsets = [0, 5, 0], sizes = [16, 1, 8], strides = [1, 1, 1]} : vector<16x16x8xf32> to vector<16x1x8xf32>
    %38 = vector.shape_cast %37 : vector<16x1x8xf32> to vector<16x8xf32>
    %39 = vector.extract_strided_slice %26 {offsets = [0, 6, 0], sizes = [16, 1, 8], strides = [1, 1, 1]} : vector<16x16x8xf32> to vector<16x1x8xf32>
    %40 = vector.shape_cast %39 : vector<16x1x8xf32> to vector<16x8xf32>
    %41 = vector.extract_strided_slice %26 {offsets = [0, 7, 0], sizes = [16, 1, 8], strides = [1, 1, 1]} : vector<16x16x8xf32> to vector<16x1x8xf32>
    %42 = vector.shape_cast %41 : vector<16x1x8xf32> to vector<16x8xf32>
    %43 = vector.extract_strided_slice %26 {offsets = [0, 8, 0], sizes = [16, 1, 8], strides = [1, 1, 1]} : vector<16x16x8xf32> to vector<16x1x8xf32>
    %44 = vector.shape_cast %43 : vector<16x1x8xf32> to vector<16x8xf32>
    %45 = vector.extract_strided_slice %26 {offsets = [0, 9, 0], sizes = [16, 1, 8], strides = [1, 1, 1]} : vector<16x16x8xf32> to vector<16x1x8xf32>
    %46 = vector.shape_cast %45 : vector<16x1x8xf32> to vector<16x8xf32>
    %47 = vector.extract_strided_slice %26 {offsets = [0, 10, 0], sizes = [16, 1, 8], strides = [1, 1, 1]} : vector<16x16x8xf32> to vector<16x1x8xf32>
    %48 = vector.shape_cast %47 : vector<16x1x8xf32> to vector<16x8xf32>
    %49 = vector.extract_strided_slice %26 {offsets = [0, 11, 0], sizes = [16, 1, 8], strides = [1, 1, 1]} : vector<16x16x8xf32> to vector<16x1x8xf32>
    %50 = vector.shape_cast %49 : vector<16x1x8xf32> to vector<16x8xf32>
    %51 = vector.extract_strided_slice %26 {offsets = [0, 12, 0], sizes = [16, 1, 8], strides = [1, 1, 1]} : vector<16x16x8xf32> to vector<16x1x8xf32>
    %52 = vector.shape_cast %51 : vector<16x1x8xf32> to vector<16x8xf32>
    %53 = vector.extract_strided_slice %26 {offsets = [0, 13, 0], sizes = [16, 1, 8], strides = [1, 1, 1]} : vector<16x16x8xf32> to vector<16x1x8xf32>
    %54 = vector.shape_cast %53 : vector<16x1x8xf32> to vector<16x8xf32>
    %55 = vector.extract_strided_slice %26 {offsets = [0, 14, 0], sizes = [16, 1, 8], strides = [1, 1, 1]} : vector<16x16x8xf32> to vector<16x1x8xf32>
    %56 = vector.shape_cast %55 : vector<16x1x8xf32> to vector<16x8xf32>
    %57 = vector.extract_strided_slice %26 {offsets = [0, 15, 0], sizes = [16, 1, 8], strides = [1, 1, 1]} : vector<16x16x8xf32> to vector<16x1x8xf32>
    %58 = vector.shape_cast %57 : vector<16x1x8xf32> to vector<16x8xf32>
    %59 = tpu.concatenate %28, %30, %32, %34, %36, %38, %40, %42, %44, %46, %48, %50, %52, %54, %56, %58 in 1 : vector<16x8xf32>, vector<16x8xf32>, vector<16x8xf32>, vector<16x8xf32>, vector<16x8xf32>, vector<16x8xf32>, vector<16x8xf32>, vector<16x8xf32>, vector<16x8xf32>, vector<16x8xf32>, vector<16x8xf32>, vector<16x8xf32>, vector<16x8xf32>, vector<16x8xf32>, vector<16x8xf32>, vector<16x8xf32> -> vector<16x128xf32>
    %c0_10 = arith.constant 0 : index
    %c0_11 = arith.constant 0 : index
    %c0_12 = arith.constant 0 : index
    %60 = vector.load %arg6[%c0_10, %c0_11, %c0_12] : memref<1x16x128xf32, #tpu.memory_space<vmem>>, vector<1x16x128xf32>
    %61 = vector.shape_cast %60 : vector<1x16x128xf32> to vector<16x128xf32>
    %62 = vector.shape_cast %59 : vector<16x128xf32> to vector<1x16x128xf32>
    tpu.vector_store %arg6[%c0_10, %c0_11, %c0_12], %62 {strides = array<i32>} : memref<1x16x128xf32, #tpu.memory_space<vmem>>, vector<1x16x128xf32>,
    return
  }
  func.func @transform_0(%arg0: i32, %arg1: i32) -> (i32, i32, i32, i32) {
    %c0_i32 = arith.constant 0 : i32
    %c0_i32_0 = arith.constant 0 : i32
    %c0_i32_1 = arith.constant 0 : i32
    %c0_i32_2 = arith.constant 0 : i32
    return %arg0, %c0_i32, %c0_i32_0, %c0_i32_1 : i32, i32, i32, i32
  }
  func.func @transform_1(%arg0: i32, %arg1: i32) -> (i32, i32) {
    %c0_i32 = arith.constant 0 : i32
    %c0_i32_0 = arith.constant 0 : i32
    %c0_i32_1 = arith.constant 0 : i32
    return %c0_i32, %c0_i32_0 : i32, i32
  }
  func.func @transform_2(%arg0: i32, %arg1: i32) -> (i32, i32) {
    %c0_i32 = arith.constant 0 : i32
    %c0_i32_0 = arith.constant 0 : i32
    %c0_i32_1 = arith.constant 0 : i32
    return %c0_i32, %c0_i32_0 : i32, i32
  }
  func.func @transform_3(%arg0: i32, %arg1: i32) -> (i32, i32) {
    %c0_i32 = arith.constant 0 : i32
    %c0_i32_0 = arith.constant 0 : i32
    %c0_i32_1 = arith.constant 0 : i32
    return %c0_i32, %c0_i32_0 : i32, i32
  }
  func.func @transform_4(%arg0: i32, %arg1: i32) -> (i32, i32, i32) {
    %c0_i32 = arith.constant 0 : i32
    %c0_i32_0 = arith.constant 0 : i32
    return %arg0, %arg1, %c0_i32 : i32, i32, i32
  }
}

</mosaic_0001>

<bundles_post_ra>
// kernel: resconv_forward.1
= control target key start
LH: loop header
LB: loop body
LE: loop exit
PB: predicated region body
PF: predicated region fallthrough
CT: control target
= control target key end

     0   :  { %s2871_s15 = smov 0   ;;  %s2873_s16 = smov 0   ;;  %s4751_s0 = inlined_call_operand.vmem [shape: f32[2,18,18,4], index: 0, kind: input, shape index: {}]   ;;  %s4752_s1 = inlined_call_operand.vmem [shape: f32[36,8], index: 1, kind: input, shape index: {}]   ;;  %s4753_s2 = inlined_call_operand.vmem [shape: f32[1,8], index: 2, kind: input, shape index: {}]   ;;  %s4754_s3 = inlined_call_operand.vmem [shape: f32[4,8], index: 3, kind: input, shape index: {}]   ;;  %s4755_s4 = inlined_call_operand.vmem [shape: f32[2,16,128], index: 4, kind: output, shape index: {}]  }
   0x1   :  { %s2875_s17 = smov 0  }
   0x2 LB: > { %s26_s18 = sadd.s32 1, %s2823_s16  ;;  %p2502_p0 = scmp.ge.s32.totalorder %s2827_s17, 1  ;;  %s2827_s17 = sphi %s2875_s17, %s14_s17   ;;  %s2823_s16 = sphi %s2873_s16, %s4886_s16   ;;  %s2819_s15 = sphi %s2871_s15, %s4885_s15  }
   0x3   : > { %p28_p1 = scmp.ge.s32.totalorder %s26_s18, 2  ;;  %p176_p2 = scmp.lt.s32.totalorder %s2827_s17, 3 }
   0x5   : > { %s4888_s18 = smov (%p28_p1, %s26_s18), 0  ;;  %p177_p3 = pnand %p2502_p0, %p176_p2 }
   0x7   : > { %180 = sbr.rel (%p177_p3) target bundleno = 803 (0x323), region = 36 }
   0xe   : > { %p206_p4 = scmp.lt.s32.totalorder %s2819_s15, 1  ;;  %vm332_vm0 = vcmask 1046528   ;;  %vm531_vm1 = vcmask 1045504   ;;  %s2829_s23 = smov 4   ;;  %vm730_vm2 = vcmask 31744   ;;  %vm767_vm3 = vcmask 64512  }
   0xf   : > { %s2830_s24 = smov 8   ;;  %vm1205_vm4 = vcmask 1043456   ;;  %s2831_s9 = smov 12   ;;  %vm1030_vm5 = vcmask 97280   ;;  %vm1063_vm6 = vcmask 195584   ;;  %vm1108_vm7 = vcmask 293888  }
  0x10   : > { %s4890_s15 = smov (!%p206_p4, %s2819_s15), 1  ;;  %s2832_s12 = smov 24   ;;  %vm1808_vm8 = vcmask 1041409   ;;  %vm1811_vm9 = vcmask 1042434   ;;  %vm1814_vm10 = vcmask 1043459   ;;  %vm1817_vm11 = vcmask 1044484  }
  0x11   : > { %s2762_s19 = smul.u32 432, %s4890_s15  ;;  %vm1820_vm12 = vcmask 1045509   ;;  %vm1823_vm13 = vcmask 1046534   ;;  %vm1826_vm14 = vcmask 1047559   ;;  %s2834_s20 = smov 64   ;;  %vm2372_vm15 = vcmask 130048  }
  0x12   : > { %s2835_s21 = smov 72   ;;  %s2838_s25 = smov 96  }
  0x13   : > { %s2895_s22 = scalar_lea.vmem %s4751_s0, %s2762_s19  ;;  %s2833_s19 = smov 56  }
  0x14   : > { %v2898_v0 = vld [vmem:[%s2895_s22 + $0x30] sm:$0xff]  ;;  %v2901_v1 = vld [vmem:[%s2895_s22 + $0x38] sm:$0xff]  ;;  %v2909_v5 = vld [vmem:[%s2895_s22 + $0x20] sm:$0xff]  ;;  %s2839_s26 = smov 16   ;;  %s2840_s27 = smov 32  }
  0x15   : > { %v2904_v2 = vld [vmem:[%s2895_s22 + $0x18] sm:$0xff]  ;;  %v343_v3 = vrot.slane %v2898_v0, 1  ;;  %v344_v4 = vrot.slane %v2901_v1, 1  ;;  %v339_v8 = vrot.slane %v2909_v5, 1  ;;  %v538_v9 = vrot.slane %v2909_v5, 2  ;;  %v2939_v24 = vld [vmem:[%s2895_s22 + $0x50] sm:$0xff] }
  0x16   : > { %v338_v6 = vrot.slane %v2904_v2, 1  ;;  %v537_v7 = vrot.slane %v2904_v2, 2  ;;  %v229_v10 = vld [vmem:[%s2895_s22 + $0x28] sm:$0x3]  ;;  %v232_v13 = vld [vmem:[%s2895_s22 + $0x40] sm:$0x3] }
  0x17   : > { %v2917_v11 = vsel %vm332_vm0, %v343_v3, %v344_v4  ;;  %v341_v12 = vrot.slane %v229_v10, 1  ;;  %v540_v16 = vrot.slane %v229_v10, 2  ;;  %v346_v18 = vrot.slane %v232_v13, 1  ;;  %v235_v25 = vld [vmem:[%s2895_s22 + $0x58] sm:$0x3]  ;;  %v2943_v26 = vld [vmem:[%s2895_s22 + $0x48] sm:$0xff] }
  0x18   : > { %431 = vrot.lane.b32.xlu1 %v2917_v11, %s2829_s23  ;;  %v340_v14 = vsel %vm332_vm0, %v338_v6, %v339_v8  ;;  %v539_v15 = vsel %vm531_vm1, %v537_v7, %v538_v9  ;;  %v543_v20 = vrot.slane %v2901_v1, 2  ;;  %v545_v21 = vrot.slane %v232_v13, 2  ;;  %v2959_v35 = vld [vmem:[%s2895_s22 + $0x68] sm:$0xff]  ;;  %v238_v36 = vld [vmem:[%s2895_s22 + $0x70] sm:$0x3]  ;;  %v2963_v37 = vld [vmem:[%s2895_s22 + $0xe0] sm:$0xff] }
  0x19   : > { %427 = vrot.lane.b32.xlu0 %v340_v14, %s2829_s23  ;;  %2706 = vmatprep.mubr.msk.f32.mxu1 %vm730_vm2, %v340_v14  ;;  %v2927_v17 = vsel %vm332_vm0, %v339_v8, %v341_v12  ;;  %v541_v19 = vsel %vm531_vm1, %v538_v9, %v540_v16  ;;  %v2935_v22 = vsel %vm332_vm0, %v344_v4, %v346_v18  ;;  %v542_v23 = vrot.slane %v2898_v0, 2  ;;  %v253_v40 = vld [vmem:[%s2895_s22 + $0xe8] sm:$0x3]  ;;  %v2971_v41 = vld [vmem:[%s2895_s22 + $0x60] sm:$0xff]  ;;  %v2978_v45 = vld [vmem:[%s2895_s22 + $0xf8] sm:$0xff]  ;;  %s2841_s28 = smov 40  }
  0x1a   : > { %v546_v27 = vsel %vm531_vm1, %v543_v20, %v545_v21  ;;  %v349_v28 = vrot.slane %v2939_v24, 1  ;;  %v351_v29 = vrot.slane %v235_v25, 1  ;;  %v348_v31 = vrot.slane %v2943_v26, 1  ;;  %4804 = vst [vmem:[#allocation2_spill] sm:$0xff] %v2959_v35  ;;  %4805 = vst [vmem:[#allocation3_spill] sm:$0xff] %v2971_v41  ;;  %v2988_v53 = vld [vmem:[%s2895_s22 + $0x110] sm:$0xff] }
  0x1b   : > { %v544_v30 = vsel %vm531_vm1, %v542_v23, %v543_v20  ;;  %v548_v33 = vrot.slane %v2939_v24, 2  ;;  %v550_v34 = vrot.slane %v235_v25, 2  ;;  %v547_v39 = vrot.slane %v2943_v26, 2  ;;  %4806 = vst [vmem:[#allocation4_spill] sm:$0xff] %v2978_v45  ;;  %v256_v46 = vld [vmem:[%s2895_s22 + $0x100] sm:$0x3] }
  0x1c   : > { %626 = vrot.lane.b32.xlu1 %v539_v15, %s2830_s24  ;;  %v2955_v32 = vsel %vm332_vm0, %v349_v28, %v351_v29  ;;  %v2966_v38 = vsel %vm332_vm0, %v348_v31, %v349_v28  ;;  %v354_v42 = vrot.slane %v2959_v35, 1  ;;  %v356_v43 = vrot.slane %v238_v36, 1  ;;  %4807 = vst [vmem:[#allocation5_spill] sm:$0xff] %v2988_v53  ;;  %v259_v57 = vld [vmem:[%s2895_s22 + $0x118] sm:$0x3]  ;;  %v3003_v60 = vld [vmem:[%s2895_s22 + $0x80] sm:$0xff] }
  0x1d   : > { %429 = vrot.lane.b32.xlu0 %v2927_v17, %s2829_s23  ;;  %v4769_v44 = vrot.slane %v2963_v37, 1  ;;  %v551_v47 = vsel %vm531_vm1, %v548_v33, %v550_v34  ;;  %v381_v48 = vrot.slane %v253_v40, 1  ;;  %v4768_v49 = vrot.slane %v2963_v37, 2  ;;  %4808 = vst [vmem:[#allocation6_spill] sm:$0xff] %v3003_v60  ;;  %v3006_v61 = vld [vmem:[%s2895_s22 + $0x88] sm:$0x3] }
  0x1e   : > { %v549_v50 = vsel %vm531_vm1, %v547_v39, %v548_v33  ;;  %v353_v51 = vrot.slane %v2971_v41, 1  ;;  %v580_v52 = vrot.slane %v253_v40, 2  ;;  %v4767_v55 = vrot.slane %v2978_v45, 1  ;;  %v3022_v8 = vld [vmem:[%s2895_s22 + $0x128] sm:$0xff]  ;;  %v262_v9 = vld [vmem:[%s2895_s22 + $0x130] sm:$0x3] }
  0x1f   : > { %v2993_v54 = vsel %vm332_vm0, %v4769_v44, %v381_v48  ;;  %v386_v56 = vrot.slane %v256_v46, 1  ;;  %v2999_v58 = vsel %vm332_vm0, %v354_v42, %v356_v43  ;;  %v553_v59 = vrot.slane %v2959_v35, 2  ;;  %4809 = vst [vmem:[#allocation7_spill] sm:$0xff] %v3022_v8  ;;  %v3030_v13 = vld [vmem:[%s2895_s22 + $0x78] sm:$0xff]  ;;  %v3040_v20 = vld [vmem:[%s2895_s22 + $0x140] sm:$0xff]  ;;  %s2842_s29 = smov 48  }
  0x20   : > { %628 = vrot.lane.b32.xlu1 %v541_v19, %s2830_s24  ;;  %v3011_v62 = vsel %vm531_vm1, %v4768_v49, %v580_v52  ;;  %v4763_v63 = vrot.slane %v2978_v45, 2  ;;  %v555_v3 = vrot.slane %v238_v36, 2  ;;  %v585_v6 = vrot.slane %v256_v46, 2  ;;  %4810 = vst [vmem:[#allocation8_spill] sm:$0xff] %v3030_v13  ;;  %4811 = vst [vmem:[#allocation9_spill] sm:$0xff] %v3040_v20  ;;  %s2843_s30 = smov 104  }
  0x21   : > { %433 = vrot.lane.b32.xlu0 %v2935_v22, %s2829_s23  ;;  %v3018_v4 = vsel %vm332_vm0, %v4767_v55, %v386_v56  ;;  %v4762_v7 = vrot.slane %v2988_v53, 1  ;;  %v3026_v10 = vsel %vm332_vm0, %v353_v51, %v354_v42  ;;  %v552_v12 = vrot.slane %v2971_v41, 2  ;;  %v265_v28 = vld [vmem:[%s2895_s22 + $0x148] sm:$0x3]  ;;  %v3070_v42 = vld [vmem:[%s2895_s22 + $0x158] sm:$0xff]  ;;  %v3172_v55 = vld [vmem:[%s2895_s22 + $0x1a0] sm:$0xff] }
  0x22   : > { %v391_v14 = vrot.slane %v259_v57, 1  ;;  %v4761_v15 = vrot.slane %v2988_v53, 2  ;;  %v359_v16 = vrot.slane %v3003_v60, 1  ;;  %v3037_v18 = vsel %vm531_vm1, %v4763_v63, %v585_v6  ;;  %4812 = vst [vmem:[#allocation10_spill] sm:$0xff] %v3070_v42  ;;  %v268_v43 = vld [vmem:[%s2895_s22 + $0x160] sm:$0x3] }
  0x23   : > { %v590_v19 = vrot.slane %v259_v57, 2  ;;  %v361_v21 = vrot.slane %v3006_v61, 1  ;;  %v4760_v25 = vrot.slane %v3022_v8, 1  ;;  %v556_v29 = vsel %vm531_vm1, %v553_v59, %v555_v3  ;;  %v3082_v56 = vld [vmem:[%s2895_s22 + $0xa0] sm:$0x3]  ;;  %v3090_v3 = vld [vmem:[%s2895_s22 + $0x170] sm:$0xff] }
  0x24   : > { %632 = vrot.lane.b32.xlu1 %v546_v27, %s2830_s24  ;;  %v3048_v23 = vsel %vm332_vm0, %v4762_v7, %v391_v14  ;;  %v396_v27 = vrot.slane %v262_v9, 1  ;;  %v4759_v33 = vrot.slane %v3022_v8, 2  ;;  %v554_v34 = vsel %vm531_vm1, %v552_v12, %v553_v59  ;;  %4814 = vst [vmem:[#allocation12_spill] sm:$0xff] %v3090_v3  ;;  %v271_v14 = vld [vmem:[%s2895_s22 + $0x178] sm:$0x3]  ;;  %s2844_s5 = smov 112  }
  0x25   : > { %630 = vrot.lane.b32.xlu0 %v544_v30, %s2830_s24  ;;  %v358_v30 = vrot.slane %v3030_v13, 1  ;;  %v3059_v31 = vsel %vm531_vm1, %v4761_v15, %v590_v19  ;;  %v595_v39 = vrot.slane %v262_v9, 2  ;;  %v4757_v40 = vrot.slane %v3040_v20, 1  ;;  %v226_v7 = vld [vmem:[%s2895_s22 + $0x10] sm:$0x3]  ;;  %s2845_s8 = smov 120  }
  0x26   : > { %v3066_v36 = vsel %vm332_vm0, %v4760_v25, %v396_v27  ;;  %v558_v46 = vrot.slane %v3003_v60, 2  ;;  %v401_v48 = vrot.slane %v265_v28, 1  ;;  %v560_v51 = vrot.slane %v3006_v61, 2  ;;  %v247_v49 = vld [vmem:[%s2895_s22 + $0xb8] sm:$0x3] }
  0x27   : > { %v557_v52 = vrot.slane %v3030_v13, 2  ;;  %v3087_v57 = vsel %vm531_vm1, %v4759_v33, %v595_v39  ;;  %v600_v59 = vrot.slane %v265_v28, 2  ;;  %v3094_v6 = vsel %vm332_vm0, %v359_v16, %v361_v21  ;;  %v3108_v28 = vld [vmem:[%s2895_s22 + $0x90] sm:$0xff] }
  0x28   : > { %437 = vrot.lane.b32.xlu1 %v2955_v32, %s2829_s23  ;;  %v3099_v61 = vsel %vm332_vm0, %v4757_v40, %v401_v48  ;;  %v4758_v9 = vrot.slane %v3070_v42, 1  ;;  %v406_v12 = vrot.slane %v268_v43, 1  ;;  %v3104_v19 = vsel %vm332_vm0, %v358_v30, %v359_v16  ;;  %4815 = vst [vmem:[#allocation13_spill] sm:$0xff] %v3108_v28  ;;  %v274_v33 = vld [vmem:[%s2895_s22 + $0x190] sm:$0x3] }
  0x29   : > { %435 = vrot.lane.b32.xlu0 %v2966_v38, %s2829_s23  ;;  %v605_v30 = vrot.slane %v268_v43, 2  ;;  %v4764_v39 = vrot.slane %v3090_v3, 1  ;;  %v411_v48 = vrot.slane %v271_v14, 1  ;;  %v363_v40 = vrot.slane %v3108_v28, 1  ;;  %v250_v35 = vld [vmem:[%s2895_s22 + $0xd0] sm:$0x3] }
  0x2a   : > { %v3120_v16 = vsel %vm332_vm0, %v4758_v9, %v406_v12  ;;  %v610_v12 = vrot.slane %v271_v14, 2  ;;  %v3136_v9 = vld [vmem:[%s2895_s22 + $0x188] sm:$0xff]  ;;  %v559_v25 = vsel %vm531_vm1, %v557_v52, %v558_v46  ;;  %v565_v52 = vrot.slane %v3082_v56, 2 }
  0x2b   : > { %4816 = vst [vmem:[#allocation14_spill] sm:$0xff] %v3136_v9  ;;  %v3143_v15 = vsel %vm332_vm0, %v4764_v39, %v411_v48  ;;  %v3162_v48 = vld [vmem:[%s2895_s22 + $0xb0] sm:$0xff]  ;;  %v416_v39 = vrot.slane %v274_v33, 1  ;;  %v4819_v13 = vrot.slane %v3136_v9, 2 }
  0x2c   : > { %636 = vrot.lane.b32.xlu1 %v551_v47, %s2830_s24  ;;  %v3075_v47 = vld [vmem:[%s2895_s22 + $0x98] sm:$0xff]  ;;  %4817 = vst [vmem:[#allocation15_spill] sm:$0xff] %v3162_v48 }
  0x2d   : > { %634 = vrot.lane.b32.xlu0 %v549_v50, %s2830_s24  ;;  %4813 = vst [vmem:[#allocation11_spill] sm:$0xff] %v3075_v47  ;;  %v4756_v50 = vrot.slane %v3040_v20, 2  ;;  %v364_v27 = vrot.slane %v3075_v47, 1  ;;  %v563_v14 = vrot.slane %v3075_v47, 2  ;;  %v535_v47 = vrot.slane %v226_v7, 2 }
  0x2f   : > { %v3113_v21 = vsel %vm531_vm1, %v4756_v50, %v600_v59  ;;  %v4766_v59 = vrot.slane %v3090_v3, 2  ;;  %v561_v50 = vsel %vm531_vm1, %v558_v46, %v560_v51  ;;  %v3146_v51 = vld [vmem:[%s2895_s22 + $0x8] sm:$0xff] }
  0x30   : > { %441 = vrot.lane.b32.xlu1 %v2999_v58, %s2829_s23 }
  0x31   : > { %439 = vrot.lane.b32.xlu0 %v3026_v10, %s2829_s23  ;;  %v3156_v46 = vsel %vm531_vm1, %v4766_v59, %v610_v12  ;;  %v4774_v12 = vrot.slane %v3146_v51, 1 }
  0x34   : > { %640 = vrot.lane.b32.xlu1 %v556_v29, %s2830_s24  ;;  %v4765_v29 = vrot.slane %v3070_v42, 2 }
  0x35   : > { %638 = vrot.lane.b32.xlu0 %v554_v34, %s2830_s24  ;;  %v366_v34 = vrot.slane %v3082_v56, 1  ;;  %v277_v56 = vld [vmem:[%s2895_s22 + $0x1a8] sm:$0x3] }
  0x36   : > { %v3133_v43 = vsel %vm531_vm1, %v4765_v29, %v605_v30  ;;  %v562_v30 = vrot.slane %v3108_v28, 2  ;;  %v3167_v29 = vsel %vm332_vm0, %v363_v40, %v364_v27  ;;  %v4776_v28 = vrot.slane %v3146_v51, 2 }
  0x37   : > { %v3150_v63 = vsel %vm332_vm0, %v364_v27, %v366_v34  ;;  %v4773_v34 = vrot.slane %v3136_v9, 1  ;;  %v369_v40 = vrot.slane %v3162_v48, 1  ;;  %v3184_v27 = vld [vmem:[%s2895_s22 + $0xa8] sm:$0xff] }
  0x38   : > { %445 = vrot.lane.b32.xlu1 %v3094_v6, %s2829_s23  ;;  %4818 = vst [vmem:[#allocation16_spill] sm:$0xff] %v3184_v27  ;;  %v564_v60 = vsel %vm531_vm1, %v562_v30, %v563_v14  ;;  %v570_v30 = vrot.slane %v247_v49, 2 }
  0x39   : > { %443 = vrot.lane.b32.xlu0 %v3104_v19, %s2829_s23  ;;  %v3179_v44 = vsel %vm332_vm0, %v4773_v34, %v416_v39  ;;  %v421_v34 = vrot.slane %v277_v56, 1 }
  0x3c   : > { %644 = vrot.lane.b32.xlu1 %v561_v50, %s2830_s24  ;;  %v336_v50 = vrot.slane %v226_v7, 1  ;;  %v3201_v7 = vsel %vm531_vm1, %v4776_v28, %v535_v47  ;;  %v368_v47 = vrot.slane %v3184_v27, 1 }
  0x3d   : > { %642 = vrot.lane.b32.xlu0 %v559_v25, %s2830_s24  ;;  %v615_v25 = vrot.slane %v274_v33, 2  ;;  %v4778_v33 = vrot.slane %v3172_v55, 1 }
  0x3e   : > { %v3189_v59 = vsel %vm332_vm0, %v4774_v12, %v336_v50  ;;  %v566_v50 = vsel %vm531_vm1, %v563_v14, %v565_v52  ;;  %v371_v12 = vrot.slane %v247_v49, 1  ;;  %v568_v14 = vrot.slane %v3162_v48, 2 }
  0x3f   : > { %v3196_v39 = vsel %vm531_vm1, %v4819_v13, %v615_v25  ;;  %v4780_v13 = vrot.slane %v3172_v55, 2  ;;  %v620_v25 = vrot.slane %v277_v56, 2  ;;  %v3213_v28 = vsel %vm332_vm0, %v4778_v33, %v421_v34  ;;  %v3231_v33 = vld [vmem:[%s2895_s22 + $0xc8] sm:$0xff] }
  0x40   : > { %449 = vrot.lane.b32.xlu1 %v3150_v63, %s2829_s23  ;;  %v3223_v52 = vsel %vm332_vm0, %v369_v40, %v371_v12  ;;  %v3227_v56 = vsel %vm332_vm0, %v368_v47, %v369_v40  ;;  %v567_v34 = vrot.slane %v3184_v27, 2  ;;  %v374_v49 = vrot.slane %v3231_v33, 1 }
  0x41   : > { %447 = vrot.lane.b32.xlu0 %v3167_v29, %s2829_s23  ;;  %v3218_v41 = vsel %vm531_vm1, %v4780_v13, %v620_v25  ;;  %4820 = vst [vmem:[#allocation17_spill] sm:$0xff] %v3223_v52  ;;  %v3235_v25 = vld [vmem:[%s2895_s22 + $0xc0] sm:$0xff]  ;;  %v376_v12 = vrot.slane %v250_v35, 1  ;;  %v573_v13 = vrot.slane %v3231_v33, 2  ;;  %v575_v27 = vrot.slane %v250_v35, 2 }
  0x42   : > { %v569_v40 = vsel %vm531_vm1, %v567_v34, %v568_v14  ;;  %v572_v48 = vrot.slane %v3235_v25, 2 }
  0x43   : > { %v3248_v47 = vsel %vm332_vm0, %v374_v49, %v376_v12 }
  0x44   : > { %648 = vrot.lane.b32.xlu1 %v566_v50, %s2830_s24  ;;  %v373_v50 = vrot.slane %v3235_v25, 1  ;;  %v574_v34 = vsel %vm531_vm1, %v572_v48, %v573_v13  ;;  %v4823_v48 = vrot.slane %v2963_v37, 2 }
  0x45   : > { %646 = vrot.lane.b32.xlu0 %v564_v60, %s2830_s24  ;;  %v571_v60 = vsel %vm531_vm1, %v568_v14, %v570_v30  ;;  %v576_v14 = vsel %vm531_vm1, %v573_v13, %v575_v27 }
  0x46   : > { %v3252_v30 = vsel %vm332_vm0, %v373_v50, %v374_v49  ;;  %v4824_v50 = vrot.slane %v2978_v45, 1 }
  0x48   : > { %453 = vrot.lane.b32.xlu1 %v3223_v52, %s2829_s23  ;;  %v3256_v52 = vld [vmem:[%s2895_s22 + $0xd8] sm:$0xff] }
  0x49   : > { %451 = vrot.lane.b32.xlu0 %v3227_v56, %s2829_s23  ;;  %v378_v35 = vrot.slane %v3256_v52, 1  ;;  %v577_v12 = vrot.slane %v3256_v52, 2 }
  0x4b   : > { %v579_v27 = vsel %vm531_vm1, %v577_v12, %v4823_v48  ;;  %v4827_v48 = vrot.slane %v2988_v53, 1 }
  0x4c   : > { %652 = vrot.lane.b32.xlu1 %v571_v60, %s2830_s24  ;;  %v4821_v60 = vrot.slane %v2963_v37, 1 }
  0x4d   : > { %650 = vrot.lane.b32.xlu0 %v569_v40, %s2830_s24  ;;  %v3274_v40 = vld [vmem:[%s2895_s22 + $0xf0] sm:$0xff] }
  0x4e   : > { %v3270_v49 = vsel %vm332_vm0, %v378_v35, %v4821_v60  ;;  %4822 = vst [vmem:[#allocation18_spill] sm:$0xff] %v3274_v40  ;;  %v383_v13 = vrot.slane %v3274_v40, 1  ;;  %v3294_v35 = vld [vmem:[%s2895_s22 + $0x108] sm:$0xff]  ;;  %v4826_v60 = vrot.slane %v2978_v45, 2  ;;  %v1099_v45 = vld [vmem:[%s4752_s1 + $0x18] sm:$0xff] }
  0x4f   : > { %4825 = vst [vmem:[#allocation19_spill] sm:$0xff] %v3294_v35  ;;  %v388_v12 = vrot.slane %v3294_v35, 1 }
  0x50   : > { %457 = vrot.lane.b32.xlu1 %v3248_v47, %s2829_s23 }
  0x51   : > { %455 = vrot.lane.b32.xlu0 %v3252_v30, %s2829_s23 }
  0x54   : > { %656 = vrot.lane.b32.xlu1 %v576_v14, %s2830_s24  ;;  %v3290_v14 = vsel %vm332_vm0, %v383_v13, %v4824_v50  ;;  %v587_v13 = vrot.slane %v3294_v35, 2  ;;  %v3314_v50 = vld [vmem:[%s2895_s22 + $0x120] sm:$0xff]  ;;  %v3334_v35 = vld [vmem:[%s2895_s22 + $0x138] sm:$0xff] }
  0x55   : > { %654 = vrot.lane.b32.xlu0 %v574_v34, %s2830_s24  ;;  %v582_v34 = vrot.slane %v3274_v40, 2  ;;  %4828 = vst [vmem:[#allocation20_spill] sm:$0xff] %v3314_v50  ;;  %4831 = vst [vmem:[#allocation21_spill] sm:$0xff] %v3334_v35  ;;  %v4844_v40 = vrot.slane %v3136_v9, 1 }
  0x58   : > { %461 = vrot.lane.b32.xlu1 %v2993_v54, %s2829_s23 }
  0x59   : > { %459 = vrot.lane.b32.xlu0 %v3270_v49, %s2829_s23 }
  0x5c   : > { %660 = vrot.lane.b32.xlu1 %v3011_v62, %s2830_s24  ;;  %v584_v62 = vsel %vm531_vm1, %v582_v34, %v4826_v60  ;;  %v4829_v34 = vrot.slane %v2988_v53, 2  ;;  %v393_v60 = vrot.slane %v3314_v50, 1 }
  0x5d   : > { %658 = vrot.lane.b32.xlu0 %v579_v27, %s2830_s24  ;;  %v3310_v27 = vsel %vm332_vm0, %v388_v12, %v4827_v48  ;;  %v592_v48 = vrot.slane %v3314_v50, 2  ;;  %v3354_v50 = vld [vmem:[%s2895_s22 + $0x150] sm:$0xff] }
  0x5e   : > { %4834 = vst [vmem:[#allocation22_spill] sm:$0xff] %v3354_v50 }
  0x60   : > { %465 = vrot.lane.b32.xlu1 %v3018_v4, %s2829_s23 }
  0x61   : > { %463 = vrot.lane.b32.xlu0 %v3290_v14, %s2829_s23 }
  0x64   : > { %664 = vrot.lane.b32.xlu1 %v3037_v18, %s2830_s24  ;;  %v589_v18 = vsel %vm531_vm1, %v587_v13, %v4829_v34  ;;  %v4832_v13 = vrot.slane %v3022_v8, 2  ;;  %v398_v34 = vrot.slane %v3334_v35, 1 }
  0x65   : > { %662 = vrot.lane.b32.xlu0 %v584_v62, %s2830_s24  ;;  %v4830_v62 = vrot.slane %v3022_v8, 1 }
  0x67   : > { %v3330_v12 = vsel %vm332_vm0, %v393_v60, %v4830_v62  ;;  %v597_v62 = vrot.slane %v3334_v35, 2  ;;  %v3374_v35 = vld [vmem:[%s2895_s22 + $0x168] sm:$0xff] }
  0x68   : > { %469 = vrot.lane.b32.xlu1 %v3048_v23, %s2829_s23  ;;  %4837 = vst [vmem:[#allocation23_spill] sm:$0xff] %v3374_v35 }
  0x69   : > { %467 = vrot.lane.b32.xlu0 %v3310_v27, %s2829_s23 }
  0x6c   : > { %668 = vrot.lane.b32.xlu1 %v3059_v31, %s2830_s24  ;;  %v594_v31 = vsel %vm531_vm1, %v592_v48, %v4832_v13  ;;  %v4835_v48 = vrot.slane %v3040_v20, 2  ;;  %v403_v13 = vrot.slane %v3354_v50, 1 }
  0x6d   : > { %666 = vrot.lane.b32.xlu0 %v589_v18, %s2830_s24  ;;  %v4833_v18 = vrot.slane %v3040_v20, 1  ;;  %v3397_v20 = vld [vmem:[%s2895_s22 + $0x180] sm:$0xff] }
  0x6e   : > { %4841 = vst [vmem:[#allocation25_spill] sm:$0xff] %v3397_v20  ;;  %v612_v8 = vrot.slane %v3397_v20, 2 }
  0x6f   : > { %v3350_v60 = vsel %vm332_vm0, %v398_v34, %v4833_v18  ;;  %v602_v18 = vrot.slane %v3354_v50, 2  ;;  %v3394_v50 = vld [vmem:[%s2895_s22] sm:$0xff] }
  0x70   : > { %473 = vrot.lane.b32.xlu1 %v3066_v36, %s2829_s23  ;;  %4840 = vst [vmem:[#allocation24_spill] sm:$0xff] %v3394_v50 }
  0x71   : > { %471 = vrot.lane.b32.xlu0 %v3330_v12, %s2829_s23 }
  0x74   : > { %672 = vrot.lane.b32.xlu1 %v3087_v57, %s2830_s24  ;;  %v599_v57 = vsel %vm531_vm1, %v597_v62, %v4835_v48  ;;  %v4838_v62 = vrot.slane %v3070_v42, 2  ;;  %v408_v48 = vrot.slane %v3374_v35, 1 }
  0x75   : > { %670 = vrot.lane.b32.xlu0 %v594_v31, %s2830_s24  ;;  %v4836_v31 = vrot.slane %v3070_v42, 1 }
  0x77   : > { %v3370_v34 = vsel %vm332_vm0, %v403_v13, %v4836_v31  ;;  %v607_v31 = vrot.slane %v3374_v35, 2  ;;  %v4843_v35 = vrot.slane %v3146_v51, 1 }
  0x78   : > { %477 = vrot.lane.b32.xlu1 %v3099_v61, %s2829_s23 }
  0x79   : > { %475 = vrot.lane.b32.xlu0 %v3350_v60, %s2829_s23 }
  0x7c   : > { %676 = vrot.lane.b32.xlu1 %v3113_v21, %s2830_s24  ;;  %v604_v21 = vsel %vm531_vm1, %v602_v18, %v4838_v62  ;;  %v4842_v62 = vrot.slane %v3090_v3, 2 }
  0x7d   : > { %674 = vrot.lane.b32.xlu0 %v599_v57, %s2830_s24  ;;  %v4839_v57 = vrot.slane %v3090_v3, 1  ;;  %v1098_v3 = vld [vmem:[%s4752_s1 + $0x10] sm:$0xff] }
  0x7f   : > { %v3390_v13 = vsel %vm332_vm0, %v408_v48, %v4839_v57  ;;  %v413_v48 = vrot.slane %v3397_v20, 1 }
  0x80   : > { %481 = vrot.lane.b32.xlu1 %v3120_v16, %s2829_s23 }
  0x81   : > { %479 = vrot.lane.b32.xlu0 %v3370_v34, %s2829_s23 }
  0x84   : > { %680 = vrot.lane.b32.xlu1 %v3133_v43, %s2830_s24  ;;  %v333_v43 = vrot.slane %v3394_v50, 1 }
  0x85   : > { %678 = vrot.lane.b32.xlu0 %v604_v21, %s2830_s24  ;;  %v609_v21 = vsel %vm531_vm1, %v607_v31, %v4842_v62  ;;  %v3418_v31 = vsel %vm332_vm0, %v413_v48, %v4844_v40  ;;  %v1096_v40 = vld [vmem:[%s4752_s1] sm:$0xff]  ;;  %v4846_v48 = vrot.slane %v3146_v51, 2 }
  0x86   : > { %v335_v42 = vsel %vm332_vm0, %v333_v43, %v4843_v35  ;;  %v532_v35 = vrot.slane %v3394_v50, 2  ;;  %v3440_v50 = vld [vmem:[%s2895_s22 + $0x198] sm:$0xff]  ;;  %s2836_s22 = smov 80  }
  0x88   : > { %485 = vrot.lane.b32.xlu1 %v3143_v15, %s2829_s23 }
  0x89   : > { %483 = vrot.lane.b32.xlu0 %v3390_v13, %s2829_s23 }
  0x8a   : > { %v432_v18 = vpop.permute.xlu1 %431 }
  0x8b   : > { %v428_v57 = vpop.permute.xlu0 %427 }
  0x8c   : > { %684 = vrot.lane.b32.xlu1 %v3156_v46, %s2830_s24  ;;  %v4845_v46 = vrot.slane %v3136_v9, 2 }
  0x8d   : > { %682 = vrot.lane.b32.xlu0 %v609_v21, %s2830_s24 }
  0x8e   : > { %v627_v53 = vpop.permute.xlu1 %626  ;;  %v614_v21 = vsel %vm531_vm1, %v612_v8, %v4845_v46  ;;  %v534_v8 = vsel %vm531_vm1, %v532_v35, %v4846_v48  ;;  %v418_v35 = vrot.slane %v3440_v50, 1 }
  0x8f   : > { %v430_v62 = vpop.permute.xlu0 %429 }
  0x90   : > { %423 = vrot.lane.b32.xlu1 %v335_v42, %s2829_s23  ;;  %v1097_v42 = vld [vmem:[%s4752_s1 + $0x8] sm:$0xff] }
  0x91   : > { %487 = vrot.lane.b32.xlu0 %v3418_v31, %s2829_s23  ;;  %v2754_v46 = vpack.c.bf16 %v1097_v42, %v1096_v40  ;;  %v2758_v40 = vpack.c.bf16 %v1099_v45, %v1098_v3  ;;  %v733_v3 = vsel %vm730_vm2, %v2904_v2, %v428_v57  ;;  %v735_v2 = vsel %vm730_vm2, %v2898_v0, %v432_v18 }
  0x92   : > { %v629_v43 = vpop.permute.xlu1 %628  ;;  %v4848_v0 = vrot.slane %v3172_v55, 2 }
  0x93   : > { %v434_v20 = vpop.permute.xlu0 %433  ;;  %2755 = vmatprep.subr.bf16.mxu0 %v2754_v46 }
  0x94   : > { %686 = vrot.lane.b32.xlu1 %v614_v21, %s2830_s24  ;;  %2757 = vmatpush3.bf16.msra.mxu0 %v2754_v46 }
  0x95   : > { %489 = vrot.lane.b32.xlu0 %v3179_v44, %s2829_s23  ;;  %2759 = vmatprep.subr.bf16.mxu0 %v2758_v40 }
  0x96   : > { %v633_v9 = vpop.permute.xlu1 %632 }
  0x97   : > { %v631_v21 = vpop.permute.xlu0 %630 }
  0x98   : > { %622 = vrot.lane.b32.xlu1 %v534_v8, %s2830_s24  ;;  %2761 = vmatpush3.bf16.msra.mxu0 %v2758_v40  ;;  %v4847_v8 = vrot.slane %v3172_v55, 1  ;;  %v3466_v40 = vsel %vm767_vm3, %v733_v3, %v627_v53  ;;  %v734_v53 = vsel %vm730_vm2, %v2909_v5, %v430_v62 }
  0x99   : > { %425 = vrot.lane.b32.xlu0 %v3189_v59, %s2829_s23  ;;  %v1100_v59 = vld [vmem:[%s4752_s1 + $0x20] sm:$0xf] }
  0x9a   : > { %v438_v42 = vpop.permute.xlu1 %437  ;;  %v420_v46 = vsel %vm332_vm0, %v418_v35, %v4847_v8  ;;  %2654 = vmatprep.subr.msk.mxu0 %vm1205_vm4, %v1100_v59  ;;  %v1466_v35 = vld [vmem:[%s4754_s3] sm:$0xf]  ;;  %vm2377_vm0 = vcmask 261120  }
  0x9b   : > { %v436_v48 = vpop.permute.xlu0 %435  ;;  %2704 = vmatprep.subr.msk.mxu1 %vm1205_vm4, %v1466_v35 }
  0x9c   : > { %624 = vrot.lane.b32.xlu1 %v3201_v7, %s2830_s24  ;;  %2655 = vmatpush3.msk.msra.mxu0 %vm1205_vm4, %v1100_v59  ;;  %v3486_v59 = vsel %vm767_vm3, %v734_v53, %v629_v43  ;;  %v736_v43 = vsel %vm730_vm2, %v2901_v1, %v434_v20  ;;  %v738_v1 = vsel %vm730_vm2, %v2939_v24, %v438_v42 }
  0x9d   : > { %688 = vrot.lane.b32.xlu0 %v3196_v39, %s2830_s24  ;;  %v617_v39 = vrot.slane %v3440_v50, 2  ;;  %2705 = vmatpush3.msk.msra.mxu1 %vm1205_vm4, %v1466_v35  ;;  %vm2386_vm4 = vcmask 457728  }
  0x9e   : > { %v637_v45 = vpop.permute.xlu1 %636  ;;  %2707 = vmatmul.mubr.msk.f32.vlgmr.msra.gmra.mrb[0].mxu1 %vm730_vm2, %v2927_v17 }
  0x9f   : > { %v635_v7 = vpop.permute.xlu0 %634  ;;  %v619_v5 = vsel %vm531_vm1, %v617_v39, %v4848_v0  ;;  %2709 = vmatprep.mubr.msk.f32.mxu1 %vm730_vm2, %v2917_v11  ;;  %v3509_v11 = vsel %vm767_vm3, %v736_v43, %v633_v9  ;;  %v3532_v20 = vsel %vm767_vm3, %v738_v1, %v637_v45  ;;  %vm2380_vm1 = vcmask 326656  }
  0xa0   : > { %491 = vrot.lane.b32.xlu1 %v420_v46, %s2829_s23  ;;  %v3482_v46 = vsel %vm767_vm3, %v735_v2, %v631_v21  ;;  %v4853_v2 = vld [vmem:[#allocation8_spill] sm:$0xff] }
  0xa1   : > { %836 = vrot.lane.b32.xlu0 %v3466_v40, %s2831_s9 }
  0xa2   : > { %v442_v57 = vpop.permute.xlu1 %441  ;;  %2710 = vmatmul.mubr.msk.f32.gmra.mrb[2].mxu1 %vm730_vm2, %v2935_v22 }
  0xa3   : > { %v440_v8 = vpop.permute.xlu0 %439  ;;  %2712 = vmatprep.mubr.msk.f32.mxu1 %vm730_vm2, %v2966_v38 }
  0xa4   : > { %934 = vrot.lane.b32.xlu1 %v3482_v46, %s2832_s12 }
  0xa5   : > { %838 = vrot.lane.b32.xlu0 %v3486_v59, %s2831_s9 }
  0xa6   : > { %v641_v18 = vpop.permute.xlu1 %640  ;;  %2713 = vmatmul.mubr.msk.f32.gmra.mrb[4].mxu1 %vm730_vm2, %v2955_v32 }
  0xa7   : > { %v639_v62 = vpop.permute.xlu0 %638  ;;  %2715 = vmatprep.mubr.msk.f32.mxu1 %vm730_vm2, %v3026_v10 }
  0xa8   : > { %690 = vrot.lane.b32.xlu1 %v619_v5, %s2830_s24 }
  0xa9   : > { %493 = vrot.lane.b32.xlu0 %v3213_v28, %s2829_s23  ;;  %v4850_v28 = vld [vmem:[#allocation3_spill] sm:$0xff]  ;;  %s2837_s23 = smov 88  }
  0xaa   : > { %v446_v17 = vpop.permute.xlu1 %445  ;;  %2716 = vmatmul.mubr.msk.f32.gmra.mrb[6].mxu1 %vm730_vm2, %v2999_v58  ;;  %v4849_v58 = vld [vmem:[#allocation2_spill] sm:$0xff] }
  0xab   : > { %v444_v21 = vpop.permute.xlu0 %443  ;;  %2718 = vmatprep.mubr.msk.f32.mxu1 %vm730_vm2, %v3104_v19 }
  0xac   : > { %692 = vrot.lane.b32.xlu1 %v3218_v41, %s2830_s24  ;;  %v737_v41 = vsel %vm730_vm2, %v2943_v26, %v436_v48 }
  0xad   : > { %936 = vrot.lane.b32.xlu0 %v3509_v11, %s2832_s12  ;;  %v3535_v9 = vsel %vm767_vm3, %v737_v41, %v635_v7  ;;  %v4852_v7 = vld [vmem:[#allocation6_spill] sm:$0xff] }
  0xae   : > { %v645_v22 = vpop.permute.xlu1 %644  ;;  %2719 = vmatmul.mubr.msk.f32.gmra.mrb[8].mxu1 %vm730_vm2, %v3094_v6  ;;  %v740_v6 = vsel %vm730_vm2, %v4849_v58, %v442_v57  ;;  %v742_v39 = vsel %vm730_vm2, %v4852_v7, %v446_v17 }
  0xaf   : > { %v643_v38 = vpop.permute.xlu0 %642  ;;  %2721 = vmatprep.mubr.msk.f32.mxu1 %vm730_vm2, %v3167_v29  ;;  %v739_v29 = vsel %vm730_vm2, %v4850_v28, %v440_v8  ;;  %v3558_v48 = vsel %vm767_vm3, %v740_v6, %v641_v18  ;;  %v3584_v53 = vsel %vm767_vm3, %v742_v39, %v645_v22  ;;  %v4855_v18 = vld [vmem:[#allocation13_spill] sm:$0xff] }
  0xb0   : > { %842 = vrot.lane.b32.xlu1 %v3509_v11, %s2831_s9  ;;  %v3561_v45 = vsel %vm767_vm3, %v739_v29, %v639_v62 }
  0xb1   : > { %840 = vrot.lane.b32.xlu0 %v3482_v46, %s2831_s9 }
  0xb2   : > { %v450_v32 = vpop.permute.xlu1 %449  ;;  %2722 = vmatmul.mubr.msk.f32.gmra.mrb[10].mxu1 %vm730_vm2, %v3150_v63  ;;  %v4851_v63 = vld [vmem:[#allocation17_spill] sm:$0xff] }
  0xb3   : > { %v448_v10 = vpop.permute.xlu0 %447  ;;  %2724 = vmatprep.mubr.msk.f32.mxu1 %vm730_vm2, %v3227_v56 }
  0xb4   : > { %940 = vrot.lane.b32.xlu1 %v3532_v20, %s2832_s12 }
  0xb5   : > { %938 = vrot.lane.b32.xlu0 %v3535_v9, %s2832_s12 }
  0xb6   : > { %v649_v24 = vpop.permute.xlu1 %648  ;;  %2725 = vmatmul.mubr.msk.f32.gmra.mrb[12].mxu1 %vm730_vm2, %v4851_v63 }
  0xb7   : > { %v647_v26 = vpop.permute.xlu0 %646  ;;  %2727 = vmatprep.mubr.msk.f32.mxu1 %vm730_vm2, %v3252_v30  ;;  %v741_v30 = vsel %vm730_vm2, %v4853_v2, %v444_v21  ;;  %v4860_v2 = vld [vmem:[#allocation5_spill] sm:$0xff] }
  0xb8   : > { %846 = vrot.lane.b32.xlu1 %v3532_v20, %s2831_s9  ;;  %v3587_v8 = vsel %vm767_vm3, %v741_v30, %v643_v38  ;;  %v4857_v38 = vld [vmem:[#allocation16_spill] sm:$0xff] }
  0xb9   : > { %844 = vrot.lane.b32.xlu0 %v3535_v9, %s2831_s9 }
  0xba   : > { %v454_v19 = vpop.permute.xlu1 %453  ;;  %2728 = vmatmul.mubr.msk.f32.gmra.mrb[14].mxu1 %vm730_vm2, %v3248_v47 }
  0xbb   : > { %v452_v42 = vpop.permute.xlu0 %451  ;;  %2730 = vmatprep.mubr.msk.f32.mxu1 %vm730_vm2, %v3270_v49 }
  0xbc   : > { %944 = vrot.lane.b32.xlu1 %v3558_v48, %s2832_s12 }
  0xbd   : > { %942 = vrot.lane.b32.xlu0 %v3561_v45, %s2832_s12 }
  0xbe   : > { %v653_v56 = vpop.permute.xlu1 %652  ;;  %2731 = vmatmul.mubr.msk.f32.gmra.mrb[16].mxu1 %vm730_vm2, %v2993_v54  ;;  %v4854_v54 = vld [vmem:[#allocation11_spill] sm:$0xff] }
  0xbf   : > { %v651_v3 = vpop.permute.xlu0 %650  ;;  %2733 = vmatprep.mubr.msk.f32.mxu1 %vm730_vm2, %v3290_v14  ;;  %v744_v0 = vsel %vm730_vm2, %v4854_v54, %v450_v32  ;;  %v743_v14 = vsel %vm730_vm2, %v4855_v18, %v448_v10 }
  0xc0   : > { %850 = vrot.lane.b32.xlu1 %v3558_v48, %s2831_s9  ;;  %v3610_v17 = vsel %vm767_vm3, %v744_v0, %v649_v24  ;;  %v3613_v43 = vsel %vm767_vm3, %v743_v14, %v647_v26 }
  0xc1   : > { %848 = vrot.lane.b32.xlu0 %v3561_v45, %s2831_s9 }
  0xc2   : > { %v458_v35 = vpop.permute.xlu1 %457  ;;  %2734 = vmatmul.mubr.msk.f32.gmra.mrb[18].mxu1 %vm730_vm2, %v3018_v4 }
  0xc3   : > { %v456_v57 = vpop.permute.xlu0 %455  ;;  %2736 = vmatprep.mubr.msk.f32.mxu1 %vm730_vm2, %v3310_v27 }
  0xc4   : > { %948 = vrot.lane.b32.xlu1 %v3584_v53, %s2832_s12 }
  0xc5   : > { %946 = vrot.lane.b32.xlu0 %v3587_v8, %s2832_s12 }
  0xc6   : > { %v657_v47 = vpop.permute.xlu1 %656  ;;  %2737 = vmatmul.mubr.msk.f32.gmra.mrb[20].mxu1 %vm730_vm2, %v3048_v23  ;;  %v4856_v23 = vld [vmem:[#allocation15_spill] sm:$0xff] }
  0xc7   : > { %v655_v49 = vpop.permute.xlu0 %654  ;;  %2739 = vmatprep.mubr.msk.f32.mxu1 %vm730_vm2, %v3330_v12  ;;  %v746_v21 = vsel %vm730_vm2, %v4856_v23, %v454_v19  ;;  %v745_v12 = vsel %vm730_vm2, %v4857_v38, %v452_v42  ;;  %v4859_v42 = vld [vmem:[#allocation18_spill] sm:$0xff]  ;;  %v4863_v23 = vld [vmem:[#allocation20_spill] sm:$0xff] }
  0xc8   : > { %854 = vrot.lane.b32.xlu1 %v3584_v53, %s2831_s9  ;;  %v3636_v32 = vsel %vm767_vm3, %v746_v21, %v653_v56  ;;  %v3639_v41 = vsel %vm767_vm3, %v745_v12, %v651_v3 }
  0xc9   : > { %852 = vrot.lane.b32.xlu0 %v3587_v8, %s2831_s9 }
  0xca   : > { %v462_v5 = vpop.permute.xlu1 %461  ;;  %2740 = vmatmul.mubr.msk.f32.gmra.mrb[22].mxu1 %vm730_vm2, %v3066_v36 }
  0xcb   : > { %v460_v62 = vpop.permute.xlu0 %459  ;;  %2742 = vmatprep.mubr.msk.f32.mxu1 %vm730_vm2, %v3350_v60 }
  0xcc   : > { %952 = vrot.lane.b32.xlu1 %v3610_v17, %s2832_s12 }
  0xcd   : > { %950 = vrot.lane.b32.xlu0 %v3613_v43, %s2832_s12 }
  0xce   : > { %v661_v4 = vpop.permute.xlu1 %660  ;;  %2743 = vmatmul.mubr.msk.f32.gmra.mrb[24].mxu1 %vm730_vm2, %v3099_v61  ;;  %v748_v61 = vsel %vm730_vm2, %v3231_v33, %v458_v35 }
  0xcf   : > { %v659_v27 = vpop.permute.xlu0 %658  ;;  %2745 = vmatprep.mubr.msk.f32.mxu1 %vm730_vm2, %v3370_v34  ;;  %v747_v34 = vsel %vm730_vm2, %v3235_v25, %v456_v57  ;;  %v3662_v24 = vsel %vm767_vm3, %v748_v61, %v657_v47  ;;  %v4861_v47 = vld [vmem:[#allocation19_spill] sm:$0xff] }
  0xd0   : > { %858 = vrot.lane.b32.xlu1 %v3610_v17, %s2831_s9  ;;  %v3665_v58 = vsel %vm767_vm3, %v747_v34, %v655_v49  ;;  %v4865_v34 = vld [vmem:[#allocation21_spill] sm:$0xff] }
  0xd1   : > { %856 = vrot.lane.b32.xlu0 %v3613_v43, %s2831_s9 }
  0xd2   : > { %v466_v22 = vpop.permute.xlu1 %465  ;;  %2746 = vmatmul.mubr.msk.f32.gmra.mrb[26].mxu1 %vm730_vm2, %v3120_v16 }
  0xd3   : > { %v464_v1 = vpop.permute.xlu0 %463  ;;  %2748 = vmatprep.mubr.msk.f32.mxu1 %vm730_vm2, %v3390_v13  ;;  %v749_v13 = vsel %vm730_vm2, %v3256_v52, %v460_v62  ;;  %v4862_v62 = vld [vmem:[#allocation7_spill] sm:$0xff] }
  0xd4   : > { %956 = vrot.lane.b32.xlu1 %v3636_v32, %s2832_s12  ;;  %v3689_v19 = vsel %vm767_vm3, %v749_v13, %v659_v27  ;;  %v751_v63 = vsel %vm730_vm2, %v4859_v42, %v464_v1 }
  0xd5   : > { %954 = vrot.lane.b32.xlu0 %v3639_v41, %s2832_s12 }
  0xd6   : > { %v665_v36 = vpop.permute.xlu1 %664  ;;  %2749 = vmatmul.mubr.msk.f32.gmra.mrb[28].mxu1 %vm730_vm2, %v3143_v15  ;;  %v750_v15 = vsel %vm730_vm2, %v2963_v37, %v462_v5  ;;  %v4858_v37 = vld [vmem:[#allocation4_spill] sm:$0xff] }
  0xd7   : > { %v663_v60 = vpop.permute.xlu0 %662  ;;  %2751 = vmatprep.mubr.msk.f32.mxu1 %vm730_vm2, %v3418_v31  ;;  %v3686_v31 = vsel %vm767_vm3, %v750_v15, %v661_v4  ;;  %v752_v52 = vsel %vm730_vm2, %v4858_v37, %v466_v22  ;;  %v4867_v37 = vld [vmem:[#allocation22_spill] sm:$0xff] }
  0xd8   : > { %862 = vrot.lane.b32.xlu1 %v3636_v32, %s2831_s9  ;;  %v3704_v56 = vsel %vm767_vm3, %v752_v52, %v665_v36  ;;  %v3707_v7 = vsel %vm767_vm3, %v751_v63, %v663_v60  ;;  %v4864_v60 = vld [vmem:[#allocation9_spill] sm:$0xff] }
  0xd9   : > { %860 = vrot.lane.b32.xlu0 %v3639_v41, %s2831_s9 }
  0xda   : > { %v470_v10 = vpop.permute.xlu1 %469  ;;  %2752 = vmatmul.mubr.msk.f32.gmra.mrb[30].mxu1 %vm730_vm2, %v3179_v44 }
  0xdb   : > { %v468_v26 = vpop.permute.xlu0 %467  ;;  %v754_v30 = vsel %vm730_vm2, %v4860_v2, %v470_v10 }
  0xdc   : > { %960 = vrot.lane.b32.xlu1 %v3662_v24, %s2832_s12  ;;  %v753_v49 = vsel %vm730_vm2, %v4861_v47, %v468_v26 }
  0xdd   : > { %958 = vrot.lane.b32.xlu0 %v3665_v58, %s2832_s12 }
  0xde   : > { %v669_v16 = vpop.permute.xlu1 %668 }
  0xdf   : > { %v667_v33 = vpop.permute.xlu0 %666  ;;  %v3722_v54 = vsel %vm767_vm3, %v754_v30, %v669_v16 }
  0xe0   : > { %866 = vrot.lane.b32.xlu1 %v3662_v24, %s2831_s9  ;;  %v3725_v5 = vsel %vm767_vm3, %v753_v49, %v667_v33 }
  0xe1   : > { %864 = vrot.lane.b32.xlu0 %v3665_v58, %s2831_s9 }
  0xe2   : > { %v474_v25 = vpop.permute.xlu1 %473 }
  0xe3   : > { %v472_v6 = vpop.permute.xlu0 %471  ;;  %v756_v4 = vsel %vm730_vm2, %v4862_v62, %v474_v25 }
  0xe4   : > { %964 = vrot.lane.b32.xlu1 %v3686_v31, %s2832_s12  ;;  %v755_v21 = vsel %vm730_vm2, %v4863_v23, %v472_v6  ;;  %v4866_v6 = vld [vmem:[#allocation10_spill] sm:$0xff] }
  0xe5   : > { %962 = vrot.lane.b32.xlu0 %v3689_v19, %s2832_s12 }
  0xe6   : > { %v673_v44 = vpop.permute.xlu1 %672 }
  0xe7   : > { %v671_v28 = vpop.permute.xlu0 %670  ;;  %v3740_v22 = vsel %vm767_vm3, %v756_v4, %v673_v44 }
  0xe8   : > { %870 = vrot.lane.b32.xlu1 %v3686_v31, %s2831_s9  ;;  %v3743_v12 = vsel %vm767_vm3, %v755_v21, %v671_v28 }
  0xe9   : > { %868 = vrot.lane.b32.xlu0 %v3689_v19, %s2831_s9 }
  0xea   : > { %v478_v29 = vpop.permute.xlu1 %477 }
  0xeb   : > { %v476_v3 = vpop.permute.xlu0 %475  ;;  %v758_v61 = vsel %vm730_vm2, %v4864_v60, %v478_v29 }
  0xec   : > { %968 = vrot.lane.b32.xlu1 %v3704_v56, %s2832_s12  ;;  %v757_v26 = vsel %vm730_vm2, %v4865_v34, %v476_v3 }
  0xed   : > { %966 = vrot.lane.b32.xlu0 %v3707_v7, %s2832_s12 }
  0xee   : > { %v677_v39 = vpop.permute.xlu1 %676 }
  0xef   : > { %v675_v35 = vpop.permute.xlu0 %674  ;;  %v3758_v16 = vsel %vm767_vm3, %v758_v61, %v677_v39  ;;  %v4872_v61 = vld [vmem:[#allocation25_spill] sm:$0xff] }
  0xf0   : > { %874 = vrot.lane.b32.xlu1 %v3704_v56, %s2831_s9  ;;  %v3761_v15 = vsel %vm767_vm3, %v757_v26, %v675_v35  ;;  %v4868_v35 = vld [vmem:[#allocation12_spill] sm:$0xff] }
  0xf1   : > { %872 = vrot.lane.b32.xlu0 %v3707_v7, %s2831_s9 }
  0xf2   : > { %v482_v57 = vpop.permute.xlu1 %481 }
  0xf3   : > { %v480_v0 = vpop.permute.xlu0 %479  ;;  %v760_v44 = vsel %vm730_vm2, %v4866_v6, %v482_v57  ;;  %v4869_v57 = vld [vmem:[#allocation23_spill] sm:$0xff] }
  0xf4   : > { %972 = vrot.lane.b32.xlu1 %v3722_v54, %s2832_s12  ;;  %v759_v52 = vsel %vm730_vm2, %v4867_v37, %v480_v0 }
  0xf5   : > { %970 = vrot.lane.b32.xlu0 %v3725_v5, %s2832_s12 }
  0xf6   : > { %v681_v18 = vpop.permute.xlu1 %680 }
  0xf7   : > { %v679_v14 = vpop.permute.xlu0 %678  ;;  %v3776_v29 = vsel %vm767_vm3, %v760_v44, %v681_v18 }
  0xf8   : > { %878 = vrot.lane.b32.xlu1 %v3722_v54, %s2831_s9  ;;  %v3779_v63 = vsel %vm767_vm3, %v759_v52, %v679_v14  ;;  %v4870_v14 = vld [vmem:[#allocation24_spill] sm:$0xff] }
  0xf9   : > { %876 = vrot.lane.b32.xlu0 %v3725_v5, %s2831_s9 }
  0xfa   : > { %v486_v27 = vpop.permute.xlu1 %485 }
  0xfb   : > { %v484_v38 = vpop.permute.xlu0 %483  ;;  %v762_v2 = vsel %vm730_vm2, %v4868_v35, %v486_v27 }
  0xfc   : > { %976 = vrot.lane.b32.xlu1 %v3740_v22, %s2832_s12  ;;  %v761_v47 = vsel %vm730_vm2, %v4869_v57, %v484_v38 }
  0xfd   : > { %974 = vrot.lane.b32.xlu0 %v3743_v12, %s2832_s12 }
  0xfe   : > { %v685_v1 = vpop.permute.xlu1 %684 }
  0xff   : > { %v683_v36 = vpop.permute.xlu0 %682  ;;  %v3794_v49 = vsel %vm767_vm3, %v762_v2, %v685_v1  ;;  %v4871_v1 = vld [vmem:[#allocation14_spill] sm:$0xff] }
 0x100   : > { %882 = vrot.lane.b32.xlu1 %v3740_v22, %s2831_s9  ;;  %v3797_v18 = vsel %vm767_vm3, %v761_v47, %v683_v36 }
 0x101   : > { %880 = vrot.lane.b32.xlu0 %v3743_v12, %s2831_s9 }
 0x102   : > { %v424_v10 = vpop.permute.xlu1 %423 }
 0x103   : > { %v488_v33 = vpop.permute.xlu0 %487  ;;  %v731_v62 = vsel %vm730_vm2, %v4870_v14, %v424_v10 }
 0x104   : > { %980 = vrot.lane.b32.xlu1 %v3758_v16, %s2832_s12  ;;  %v763_v10 = vsel %vm730_vm2, %v4872_v61, %v488_v33 }
 0x105   : > { %978 = vrot.lane.b32.xlu0 %v3761_v15, %s2832_s12 }
 0x106   : > { %v687_v25 = vpop.permute.xlu1 %686 }
 0x107   : > { %v490_v13 = vpop.permute.xlu0 %489  ;;  %v800_v6 = vsel %vm767_vm3, %v763_v10, %v687_v25 }
 0x108   : > { %886 = vrot.lane.b32.xlu1 %v3758_v16, %s2831_s9  ;;  %v764_v36 = vsel %vm730_vm2, %v4871_v1, %v490_v13 }
 0x109   : > { %884 = vrot.lane.b32.xlu0 %v3761_v15, %s2831_s9 }
 0x10a   : > { %v623_v28 = vpop.permute.xlu1 %622 }
 0x10b   : > { %v426_v42 = vpop.permute.xlu0 %425  ;;  %v768_v4 = vsel %vm767_vm3, %v731_v62, %v623_v28 }
 0x10c   : > { %984 = vrot.lane.b32.xlu1 %v3776_v29, %s2832_s12  ;;  %v732_v44 = vsel %vm730_vm2, %v3146_v51, %v426_v42 }
 0x10d   : > { %982 = vrot.lane.b32.xlu0 %v3779_v63, %s2832_s12 }
 0x10e   : > { %v625_v3 = vpop.permute.xlu1 %624 }
 0x10f   : > { %v689_v39 = vpop.permute.xlu0 %688  ;;  %v769_v28 = vsel %vm767_vm3, %v732_v44, %v625_v3 }
 0x110   : > { %890 = vrot.lane.b32.xlu1 %v3776_v29, %s2831_s9  ;;  %v801_v34 = vsel %vm767_vm3, %v764_v36, %v689_v39 }
 0x111   : > { %888 = vrot.lane.b32.xlu0 %v3779_v63, %s2831_s9 }
 0x112   : > { %v492_v30 = vpop.permute.xlu1 %491 }
 0x113   : > { %v837_v0 = vpop.permute.xlu0 %836  ;;  %v765_v42 = vsel %vm730_vm2, %v3440_v50, %v492_v30 }
 0x114   : > { %988 = vrot.lane.b32.xlu1 %v3794_v49, %s2832_s12  ;;  %v1031_v27 = vsel %vm1030_vm5, %v768_v4, %v837_v0 }
 0x115   : > { %986 = vrot.lane.b32.xlu0 %v3797_v18, %s2832_s12 }
 0x116   : > { %v935_v23 = vpop.permute.xlu1 %934 }
 0x117   : > { %v839_v21 = vpop.permute.xlu0 %838  ;;  %v1064_v38 = vsel %vm1063_vm6, %v1031_v27, %v935_v23 }
 0x118   : > { %894 = vrot.lane.b32.xlu1 %v3794_v49, %s2831_s9  ;;  %2656 = vmatprep.mubr.msk.f32.mxu0 %vm1108_vm7, %v1064_v38  ;;  %v1032_v13 = vsel %vm1030_vm5, %v769_v28, %v839_v21 }
 0x119   : > { %892 = vrot.lane.b32.xlu0 %v3797_v18, %s2831_s9 }
 0x11a   : > { %v691_v60 = vpop.permute.xlu1 %690 }
 0x11b   : > { %v494_v26 = vpop.permute.xlu0 %493  ;;  %v802_v35 = vsel %vm767_vm3, %v765_v42, %v691_v60 }
 0x11c   : > { %992 = vrot.lane.b32.xlu1 %v801_v34, %s2832_s12  ;;  %v766_v25 = vsel %vm730_vm2, %v3172_v55, %v494_v26  ;;  %vm2383_vm2 = vcmask 392192  }
 0x11d   : > { %990 = vrot.lane.b32.xlu0 %v800_v6, %s2832_s12 }
 0x11e   : > { %v693_v37 = vpop.permute.xlu1 %692 }
 0x11f   : > { %v937_v52 = vpop.permute.xlu0 %936  ;;  %v803_v3 = vsel %vm767_vm3, %v766_v25, %v693_v37 }
 0x120   : > { %v1065_v33 = vsel %vm1063_vm6, %v1032_v13, %v937_v52  ;;  %898 = vrot.lane.b32.xlu1 %v801_v34, %s2831_s9 }
 0x121   : > { %896 = vrot.lane.b32.xlu0 %v800_v6, %s2831_s9  ;;  %2657 = vmatmul.mubr.msk.f32.vlgmr.msra.gmra.mrb[0].mxu0 %vm1108_vm7, %v1065_v33 }
 0x122   : > { %v843_v51 = vpop.permute.xlu1 %842 }
 0x123   : > { %v841_v39 = vpop.permute.xlu0 %840  ;;  %v1034_v2 = vsel %vm1030_vm5, %v3486_v59, %v843_v51 }
 0x124   : > { %996 = vrot.lane.b32.xlu1 %v803_v3, %s2832_s12  ;;  %v1033_v55 = vsel %vm1030_vm5, %v3466_v40, %v841_v39 }
 0x125   : > { %994 = vrot.lane.b32.xlu0 %v802_v35, %s2832_s12 }
 0x126   : > { %v941_v57 = vpop.permute.xlu1 %940 }
 0x127   : > { %v939_v47 = vpop.permute.xlu0 %938  ;;  %v1067_v0 = vsel %vm1063_vm6, %v1034_v2, %v941_v57 }
 0x128   : > { %v1066_v50 = vsel %vm1063_vm6, %v1033_v55, %v939_v47 }
 0x129   : > { %2659 = vmatprep.mubr.msk.f32.mxu0 %vm1108_vm7, %v1066_v50 }
 0x12a   : > { %2660 = vmatmul.mubr.msk.f32.gmra.mrb[2].mxu0 %vm1108_vm7, %v1067_v0  ;;  %v847_v30 = vpop.permute.xlu1 %846 }
 0x12b   : > { %v845_v14 = vpop.permute.xlu0 %844  ;;  %v1036_v62 = vsel %vm1030_vm5, %v3509_v11, %v847_v30 }
 0x12c   : > { %v1035_v59 = vsel %vm1030_vm5, %v3482_v46, %v845_v14 }
 0x12e   : > { %v945_v4 = vpop.permute.xlu1 %944 }
 0x12f   : > { %v943_v27 = vpop.permute.xlu0 %942  ;;  %v1069_v40 = vsel %vm1063_vm6, %v1036_v62, %v945_v4 }
 0x130   : > { %v1068_v23 = vsel %vm1063_vm6, %v1035_v59, %v943_v27 }
 0x131   : > { %2662 = vmatprep.mubr.msk.f32.mxu0 %vm1108_vm7, %v1068_v23 }
 0x132   : > { %2663 = vmatmul.mubr.msk.f32.gmra.mrb[4].mxu0 %vm1108_vm7, %v1069_v40  ;;  %v851_v21 = vpop.permute.xlu1 %850 }
 0x133   : > { %v849_v38 = vpop.permute.xlu0 %848  ;;  %v1038_v1 = vsel %vm1030_vm5, %v3532_v20, %v851_v21 }
 0x134   : > { %v1037_v11 = vsel %vm1030_vm5, %v3535_v9, %v849_v38 }
 0x136   : > { %v949_v36 = vpop.permute.xlu1 %948 }
 0x137   : > { %v947_v60 = vpop.permute.xlu0 %946  ;;  %v1071_v46 = vsel %vm1063_vm6, %v1038_v1, %v949_v36 }
 0x138   : > { %v1070_v61 = vsel %vm1063_vm6, %v1037_v11, %v947_v60 }
 0x139   : > { %2665 = vmatprep.mubr.msk.f32.mxu0 %vm1108_vm7, %v1070_v61 }
 0x13a   : > { %2666 = vmatmul.mubr.msk.f32.gmra.mrb[6].mxu0 %vm1108_vm7, %v1071_v46  ;;  %v855_v10 = vpop.permute.xlu1 %854 }
 0x13b   : > { %v853_v34 = vpop.permute.xlu0 %852  ;;  %v1040_v26 = vsel %vm1030_vm5, %v3558_v48, %v855_v10 }
 0x13c   : > { %v1039_v20 = vsel %vm1030_vm5, %v3561_v45, %v853_v34 }
 0x13e   : > { %v953_v6 = vpop.permute.xlu1 %952 }
 0x13f   : > { %v951_v44 = vpop.permute.xlu0 %950  ;;  %v1073_v9 = vsel %vm1063_vm6, %v1040_v26, %v953_v6 }
 0x140   : > { %v1072_v28 = vsel %vm1063_vm6, %v1039_v20, %v951_v44 }
 0x141   : > { %2668 = vmatprep.mubr.msk.f32.mxu0 %vm1108_vm7, %v1072_v28 }
 0x142   : > { %2669 = vmatmul.mubr.msk.f32.gmra.mrb[8].mxu0 %vm1108_vm7, %v1073_v9  ;;  %v859_v37 = vpop.permute.xlu1 %858 }
 0x143   : > { %v857_v13 = vpop.permute.xlu0 %856  ;;  %v1042_v52 = vsel %vm1030_vm5, %v3584_v53, %v859_v37 }
 0x144   : > { %v1041_v48 = vsel %vm1030_vm5, %v3587_v8, %v857_v13 }
 0x146   : > { %v957_v33 = vpop.permute.xlu1 %956 }
 0x147   : > { %v955_v25 = vpop.permute.xlu0 %954  ;;  %v1075_v45 = vsel %vm1063_vm6, %v1042_v52, %v957_v33 }
 0x148   : > { %v1074_v51 = vsel %vm1063_vm6, %v1041_v48, %v955_v25 }
 0x149   : > { %2671 = vmatprep.mubr.msk.f32.mxu0 %vm1108_vm7, %v1074_v51 }
 0x14a   : > { %2672 = vmatmul.mubr.msk.f32.gmra.mrb[10].mxu0 %vm1108_vm7, %v1075_v45  ;;  %v863_v42 = vpop.permute.xlu1 %862 }
 0x14b   : > { %v861_v3 = vpop.permute.xlu0 %860  ;;  %v1044_v39 = vsel %vm1030_vm5, %v3610_v17, %v863_v42 }
 0x14c   : > { %v1043_v53 = vsel %vm1030_vm5, %v3613_v43, %v861_v3 }
 0x14e   : > { %v961_v35 = vpop.permute.xlu1 %960 }
 0x14f   : > { %v959_v2 = vpop.permute.xlu0 %958  ;;  %v1077_v8 = vsel %vm1063_vm6, %v1044_v39, %v961_v35 }
 0x150   : > { %v1076_v57 = vsel %vm1063_vm6, %v1043_v53, %v959_v2 }
 0x151   : > { %2674 = vmatprep.mubr.msk.f32.mxu0 %vm1108_vm7, %v1076_v57 }
 0x152   : > { %2675 = vmatmul.mubr.msk.f32.gmra.mrb[12].mxu0 %vm1108_vm7, %v1077_v8  ;;  %v867_v55 = vpop.permute.xlu1 %866 }
 0x153   : > { %v865_v47 = vpop.permute.xlu0 %864  ;;  %v1046_v0 = vsel %vm1030_vm5, %v3636_v32, %v867_v55 }
 0x154   : > { %v1045_v17 = vsel %vm1030_vm5, %v3639_v41, %v865_v47 }
 0x156   : > { %v965_v50 = vpop.permute.xlu1 %964 }
 0x157   : > { %v963_v30 = vpop.permute.xlu0 %962  ;;  %v1079_v43 = vsel %vm1063_vm6, %v1046_v0, %v965_v50 }
 0x158   : > { %v1078_v14 = vsel %vm1063_vm6, %v1045_v17, %v963_v30 }
 0x159   : > { %2677 = vmatprep.mubr.msk.f32.mxu0 %vm1108_vm7, %v1078_v14 }
 0x15a   : > { %2678 = vmatmul.mubr.msk.f32.gmra.mrb[14].mxu0 %vm1108_vm7, %v1079_v43  ;;  %v871_v62 = vpop.permute.xlu1 %870 }
 0x15b   : > { %v869_v4 = vpop.permute.xlu0 %868  ;;  %v1048_v59 = vsel %vm1030_vm5, %v3662_v24, %v871_v62 }
 0x15c   : > { %v1047_v32 = vsel %vm1030_vm5, %v3665_v58, %v869_v4 }
 0x15e   : > { %v969_v27 = vpop.permute.xlu1 %968 }
 0x15f   : > { %v967_v40 = vpop.permute.xlu0 %966  ;;  %v1081_v41 = vsel %vm1063_vm6, %v1048_v59, %v969_v27 }
 0x160   : > { %v1080_v23 = vsel %vm1063_vm6, %v1047_v32, %v967_v40 }
 0x161   : > { %2680 = vmatprep.mubr.msk.f32.mxu0 %vm1108_vm7, %v1080_v23 }
 0x162   : > { %2681 = vmatmul.mubr.msk.f32.gmra.mrb[16].mxu0 %vm1108_vm7, %v1081_v41  ;;  %v875_v21 = vpop.permute.xlu1 %874 }
 0x163   : > { %v873_v38 = vpop.permute.xlu0 %872  ;;  %v1050_v1 = vsel %vm1030_vm5, %v3686_v31, %v875_v21 }
 0x164   : > { %v1049_v24 = vsel %vm1030_vm5, %v3689_v19, %v873_v38 }
 0x166   : > { %v973_v36 = vpop.permute.xlu1 %972 }
 0x167   : > { %v971_v11 = vpop.permute.xlu0 %970  ;;  %v1083_v58 = vsel %vm1063_vm6, %v1050_v1, %v973_v36 }
 0x168   : > { %v1082_v60 = vsel %vm1063_vm6, %v1049_v24, %v971_v11 }
 0x169   : > { %2683 = vmatprep.mubr.msk.f32.mxu0 %vm1108_vm7, %v1082_v60 }
 0x16a   : > { %2684 = vmatmul.mubr.msk.f32.gmra.mrb[18].mxu0 %vm1108_vm7, %v1083_v58  ;;  %v879_v46 = vpop.permute.xlu1 %878 }
 0x16b   : > { %v877_v61 = vpop.permute.xlu0 %876  ;;  %v1052_v10 = vsel %vm1030_vm5, %v3704_v56, %v879_v46 }
 0x16c   : > { %v1051_v31 = vsel %vm1030_vm5, %v3707_v7, %v877_v61 }
 0x16e   : > { %v977_v34 = vpop.permute.xlu1 %976 }
 0x16f   : > { %v975_v26 = vpop.permute.xlu0 %974  ;;  %v1085_v19 = vsel %vm1063_vm6, %v1052_v10, %v977_v34 }
 0x170   : > { %v1084_v6 = vsel %vm1063_vm6, %v1051_v31, %v975_v26 }
 0x171   : > { %2686 = vmatprep.mubr.msk.f32.mxu0 %vm1108_vm7, %v1084_v6  ;;  %v3923_v52 = vpop.f32.mrb[0].mxu1 }
 0x172   : > { %2687 = vmatmul.mubr.msk.f32.gmra.mrb[20].mxu0 %vm1108_vm7, %v1085_v19  ;;  %v883_v20 = vpop.permute.xlu1 %882  ;;  %v3926_v33 = vpop.f32.mrb[1].mxu1 }
 0x173   : > { %v881_v44 = vpop.permute.xlu0 %880  ;;  %v1054_v9 = vsel %vm1030_vm5, %v3722_v54, %v883_v20 }
 0x174   : > { %v1053_v56 = vsel %vm1030_vm5, %v3725_v5, %v881_v44 }
 0x175   : > { %v3936_v39 = vpop.f32.mrb[2].mxu1 }
 0x176   : > { %v981_v28 = vpop.permute.xlu1 %980  ;;  %v3939_v53 = vpop.f32.mrb[3].mxu1 }
 0x177   : > { %v979_v37 = vpop.permute.xlu0 %978  ;;  %v1087_v7 = vsel %vm1063_vm6, %v1054_v9, %v981_v28 }
 0x178   : > { %v1086_v13 = vsel %vm1063_vm6, %v1053_v56, %v979_v37 }
 0x179   : > { %2689 = vmatprep.mubr.msk.f32.mxu0 %vm1108_vm7, %v1086_v13  ;;  %v3948_v0 = vpop.f32.mrb[4].mxu1  ;;  %v4022_v13 = vld [vmem:[%s4753_s2] ss:$0 sm:$0xff] }
 0x17a   : > { %2690 = vmatmul.mubr.msk.f32.gmra.mrb[22].mxu0 %vm1108_vm7, %v1087_v7  ;;  %v887_v48 = vpop.permute.xlu1 %886  ;;  %v3951_v17 = vpop.f32.mrb[5].mxu1 }
 0x17b   : > { %v885_v25 = vpop.permute.xlu0 %884  ;;  %v1056_v54 = vsel %vm1030_vm5, %v3740_v22, %v887_v48 }
 0x17c   : > { %v1055_v5 = vsel %vm1030_vm5, %v3743_v12, %v885_v25 }
 0x17d   : > { %v3960_v59 = vpop.f32.mrb[6].mxu1 }
 0x17e   : > { %v985_v45 = vpop.permute.xlu1 %984  ;;  %v3963_v32 = vpop.f32.mrb[7].mxu1 }
 0x17f   : > { %v983_v51 = vpop.permute.xlu0 %982  ;;  %v1089_v42 = vsel %vm1063_vm6, %v1056_v54, %v985_v45 }
 0x180   : > { %v1088_v3 = vsel %vm1063_vm6, %v1055_v5, %v983_v51 }
 0x181   : > { %2692 = vmatprep.mubr.msk.f32.mxu0 %vm1108_vm7, %v1088_v3  ;;  %v3972_v1 = vpop.f32.mrb[8].mxu1 }
 0x182   : > { %2693 = vmatmul.mubr.msk.f32.gmra.mrb[24].mxu0 %vm1108_vm7, %v1089_v42  ;;  %v891_v35 = vpop.permute.xlu1 %890  ;;  %v3975_v36 = vpop.f32.mrb[9].mxu1 }
 0x183   : > { %v889_v2 = vpop.permute.xlu0 %888  ;;  %v1058_v22 = vsel %vm1030_vm5, %v3758_v16, %v891_v35 }
 0x184   : > { %v1057_v12 = vsel %vm1030_vm5, %v3761_v15, %v889_v2 }
 0x185   : > { %v3977_v24 = vpop.f32.mrb[10].mxu1 }
 0x186   : > { %v989_v8 = vpop.permute.xlu1 %988 }
 0x187   : > { %v987_v57 = vpop.permute.xlu0 %986  ;;  %v1091_v55 = vsel %vm1063_vm6, %v1058_v22, %v989_v8 }
 0x188   : > { %v1090_v47 = vsel %vm1063_vm6, %v1057_v12, %v987_v57 }
 0x189   : > { %2695 = vmatprep.mubr.msk.f32.mxu0 %vm1108_vm7, %v1090_v47 }
 0x18a   : > { %2696 = vmatmul.mubr.msk.f32.gmra.mrb[26].mxu0 %vm1108_vm7, %v1091_v55  ;;  %v895_v50 = vpop.permute.xlu1 %894 }
 0x18b   : > { %v893_v30 = vpop.permute.xlu0 %892  ;;  %v1060_v16 = vsel %vm1030_vm5, %v3776_v29, %v895_v50 }
 0x18c   : > { %v1059_v15 = vsel %vm1030_vm5, %v3779_v63, %v893_v30 }
 0x18e   : > { %v993_v43 = vpop.permute.xlu1 %992 }
 0x18f   : > { %v991_v14 = vpop.permute.xlu0 %990  ;;  %v1093_v62 = vsel %vm1063_vm6, %v1060_v16, %v993_v43 }
 0x190   : > { %v1092_v4 = vsel %vm1063_vm6, %v1059_v15, %v991_v14 }
 0x191   : > { %2698 = vmatprep.mubr.msk.f32.mxu0 %vm1108_vm7, %v1092_v4 }
 0x192   : > { %2699 = vmatmul.mubr.msk.f32.gmra.mrb[28].mxu0 %vm1108_vm7, %v1093_v62  ;;  %v899_v27 = vpop.permute.xlu1 %898 }
 0x193   : > { %v897_v40 = vpop.permute.xlu0 %896  ;;  %v1062_v29 = vsel %vm1030_vm5, %v3794_v49, %v899_v27  ;;  %v3979_v49 = vpop.f32.mrb[11].mxu1 }
 0x194   : > { %v1061_v63 = vsel %vm1030_vm5, %v3797_v18, %v897_v40  ;;  %v3981_v11 = vpop.f32.mrb[12].mxu1  ;;  %vm2389_vm5 = vcmask 523264  }
 0x195   : > { %v3983_v18 = vpop.f32.mrb[13].mxu1 }
 0x196   : > { %v997_v41 = vpop.permute.xlu1 %996  ;;  %v3985_v58 = vpop.f32.mrb[14].mxu1 }
 0x197   : > { %v995_v23 = vpop.permute.xlu0 %994  ;;  %v1095_v21 = vsel %vm1063_vm6, %v1062_v29, %v997_v41  ;;  %v3987_v60 = vpop.f32.mrb[15].mxu1 }
 0x198   : > { %v1094_v38 = vsel %vm1063_vm6, %v1061_v63, %v995_v23  ;;  %v3989_v46 = vpop.f32.mrb[16].mxu1 }
 0x199   : > { %2701 = vmatprep.mubr.msk.f32.mxu0 %vm1108_vm7, %v1094_v38  ;;  %v3991_v61 = vpop.f32.mrb[17].mxu1 }
 0x19a   : > { %2702 = vmatmul.mubr.msk.f32.gmra.mrb[30].mxu0 %vm1108_vm7, %v1095_v21  ;;  %v3993_v10 = vpop.f32.mrb[18].mxu1  ;;  %vm2392_vm7 = vcmask 588800  }
 0x19b   : > { %v3995_v34 = vpop.f32.mrb[19].mxu1 }
 0x19c   : > { %v3997_v31 = vpop.f32.mrb[20].mxu1 }
 0x19d   : > { %v3999_v26 = vpop.f32.mrb[21].mxu1 }
 0x19e   : > { %v4001_v19 = vpop.f32.mrb[22].mxu1 }
 0x19f   : > { %v4003_v6 = vpop.f32.mrb[23].mxu1 }
 0x1a1   : > { %v4005_v20 = vpop.f32.mrb[24].mxu1 }
 0x1a2   : > { %v4007_v44 = vpop.f32.mrb[25].mxu1 }
 0x1a5   : > { %v4009_v9 = vpop.f32.mrb[26].mxu1 }
 0x1a6   : > { %v4011_v28 = vpop.f32.mrb[27].mxu1 }
 0x1a9   : > { %v4013_v56 = vpop.f32.mrb[28].mxu1 }
 0x1aa   : > { %v4015_v37 = vpop.f32.mrb[29].mxu1 }
 0x1ad   : > { %v4017_v7 = vpop.f32.mrb[30].mxu1 }
 0x1ae   : > { %v4024_v48 = vpop.f32.mrb[31].mxu1 }
 0x1f4   : > { %v2658_v25 = vpop.f32.mrb[0].mxu0 }
 0x1f5   : > { %v1281_v54 = vadd.f32 %v2658_v25, %v4022_v13  ;;  %v1275_v45 = vpop.f32.mrb[1].mxu0 }
 0x1f6   : > { %v1276_v5 = vadd.f32 %v4022_v13, %v1275_v45 }
 0x1f7   : > { %v1435_v51 = vmax.f32 %v1281_v54, 0.0 }
 0x1f8   : > { %v1434_v42 = vmax.f32 %v1276_v5, 0.0 }
 0x1f9   : > { %v4029_v3 = vadd.f32 %v3923_v52, %v1435_v51 }
 0x1fa   : > { %v4032_v35 = vadd.f32 %v3926_v33, %v1434_v42 }
 0x1fb   : > { %v2132_v57 = vrot.slane %v4029_v3, 1  ;;  %v2166_v55 = vrot.slane %v4029_v3, 2  ;;  %v2200_v52 = vrot.slane %v4029_v3, 3  ;;  %v2234_v30 = vrot.slane %v4029_v3, 4 }
 0x1fc   : > { %4873 = vst [vmem:[#allocation2_spill] sm:$0xff] %v4032_v35  ;;  %v2048_v50 = vrot.slane %v4032_v35, 7  ;;  %v1844_v16 = vrot.slane %v4032_v35, 1  ;;  %v1878_v43 = vrot.slane %v4032_v35, 2  ;;  %v1912_v15 = vrot.slane %v4032_v35, 3 }
 0x1fd   : > { %v2661_v2 = vpop.f32.mrb[2].mxu0  ;;  %v1946_v62 = vrot.slane %v4032_v35, 4  ;;  %v1980_v4 = vrot.slane %v4032_v35, 5  ;;  %v2014_v27 = vrot.slane %v4032_v35, 6  ;;  %v2268_v29 = vrot.slane %v4029_v3, 5 }
 0x1fe   : > { %v1291_v22 = vadd.f32 %v2661_v2, %v4022_v13  ;;  %v1285_v8 = vpop.f32.mrb[3].mxu0  ;;  %v2302_v41 = vrot.slane %v4029_v3, 6 }
 0x1ff   : > { %v1286_v12 = vadd.f32 %v4022_v13, %v1285_v8 }
 0x200   : > { %v1437_v47 = vmax.f32 %v1291_v22, 0.0 }
 0x201   : > { %v1436_v33 = vmax.f32 %v1286_v12, 0.0 }
 0x202   : > { %v4045_v14 = vadd.f32 %v3936_v39, %v1437_v47 }
 0x203   : > { %v4051_v40 = vadd.f32 %v3939_v53, %v1436_v33 }
 0x204   : > { %v2098_v23 = vrot.slane %v4045_v14, 7  ;;  %v2133_v39 = vsel %vm1808_vm8, %v4045_v14, %v2132_v57  ;;  %v2167_v21 = vrot.slane %v4045_v14, 1  ;;  %v2201_v38 = vrot.slane %v4045_v14, 2 }
 0x205   : > { %4874 = vst [vmem:[#allocation3_spill] sm:$0xff] %v4051_v40  ;;  %v2664_v25 = vpop.f32.mrb[4].mxu0  ;;  %v2049_v54 = vrot.slane %v4051_v40, 6  ;;  %v2235_v53 = vrot.slane %v4045_v14, 3  ;;  %v1845_v45 = vsel %vm1808_vm8, %v4051_v40, %v1844_v16  ;;  %v1879_v5 = vrot.slane %v4051_v40, 1 }
 0x206   : > { %v1301_v51 = vadd.f32 %v2664_v25, %v4022_v13  ;;  %v1295_v42 = vpop.f32.mrb[5].mxu0  ;;  %v2099_v2 = vsel %vm1808_vm8, %v2098_v23, %v4029_v3  ;;  %v2168_v22 = vsel %vm1808_vm8, %v2167_v21, %v2166_v55  ;;  %v2202_v8 = vsel %vm1808_vm8, %v2201_v38, %v2200_v52 }
 0x207   : > { %v1296_v12 = vadd.f32 %v4022_v13, %v1295_v42  ;;  %v2050_v57 = vsel %vm1808_vm8, %v2049_v54, %v2048_v50  ;;  %v2236_v47 = vsel %vm1808_vm8, %v2235_v53, %v2234_v30  ;;  %v1880_v33 = vsel %vm1808_vm8, %v1879_v5, %v1878_v43 }
 0x208   : > { %v1439_v16 = vmax.f32 %v1301_v51, 0.0  ;;  %v1913_v63 = vrot.slane %v4051_v40, 2  ;;  %v1947_v25 = vrot.slane %v4051_v40, 3  ;;  %v1981_v35 = vrot.slane %v4051_v40, 4 }
 0x209   : > { %v1438_v23 = vmax.f32 %v1296_v12, 0.0  ;;  %v2015_v55 = vrot.slane %v4051_v40, 5  ;;  %v2269_v52 = vrot.slane %v4045_v14, 4  ;;  %v2303_v21 = vrot.slane %v4045_v14, 5 }
 0x20a   : > { %v4082_v50 = vadd.f32 %v3948_v0, %v1439_v16  ;;  %v1914_v30 = vsel %vm1808_vm8, %v1913_v63, %v1912_v15  ;;  %v1948_v43 = vsel %vm1808_vm8, %v1947_v25, %v1946_v62  ;;  %v1982_v38 = vsel %vm1808_vm8, %v1981_v35, %v1980_v4 }
 0x20b   : > { %v4088_v54 = vadd.f32 %v3951_v17, %v1438_v23  ;;  %v2016_v53 = vsel %vm1808_vm8, %v2015_v55, %v2014_v27  ;;  %v2270_v5 = vsel %vm1808_vm8, %v2269_v52, %v2268_v29  ;;  %v2304_v51 = vsel %vm1808_vm8, %v2303_v21, %v2302_v41 }
 0x20c   : > { %v2100_v42 = vrot.slane %v4082_v50, 6  ;;  %v2134_v0 = vrot.slane %v4082_v50, 7  ;;  %v2169_v15 = vsel %vm1811_vm9, %v4082_v50, %v2168_v22  ;;  %v2203_v62 = vrot.slane %v4082_v50, 1 }
 0x20d   : > { %4875 = vst [vmem:[#allocation17_spill] sm:$0xff] %v4088_v54  ;;  %v2667_v63 = vpop.f32.mrb[6].mxu0  ;;  %v2051_v35 = vrot.slane %v4088_v54, 5  ;;  %v2237_v17 = vrot.slane %v4082_v50, 2  ;;  %v1846_v4 = vrot.slane %v4088_v54, 7  ;;  %v1881_v27 = vsel %vm1811_vm9, %v4088_v54, %v1880_v33 }
 0x20e   : > { %v1311_v29 = vadd.f32 %v2667_v63, %v4022_v13  ;;  %v1305_v41 = vpop.f32.mrb[7].mxu0  ;;  %v2101_v12 = vsel %vm1811_vm9, %v2100_v42, %v2099_v2  ;;  %v2135_v16 = vsel %vm1811_vm9, %v2134_v0, %v2133_v39  ;;  %v2204_v22 = vsel %vm1811_vm9, %v2203_v62, %v2202_v8 }
 0x20f   : > { %v1306_v25 = vadd.f32 %v4022_v13, %v1305_v41  ;;  %v2052_v23 = vsel %vm1811_vm9, %v2051_v35, %v2050_v57  ;;  %v2238_v55 = vsel %vm1811_vm9, %v2237_v17, %v2236_v47  ;;  %v1847_v52 = vsel %vm1811_vm9, %v1846_v4, %v1845_v45 }
 0x210   : > { %v1441_v21 = vmax.f32 %v1311_v29, 0.0  ;;  %v1915_v33 = vrot.slane %v4088_v54, 1  ;;  %v1949_v63 = vrot.slane %v4088_v54, 2  ;;  %v1983_v40 = vrot.slane %v4088_v54, 3 }
 0x211   : > { %v1440_v2 = vmax.f32 %v1306_v25, 0.0  ;;  %v2017_v39 = vrot.slane %v4088_v54, 4  ;;  %v2271_v8 = vrot.slane %v4082_v50, 3  ;;  %v2305_v42 = vrot.slane %v4082_v50, 4 }
 0x212   : > { %v4118_v57 = vadd.f32 %v3960_v59, %v1441_v21  ;;  %v1916_v45 = vsel %vm1811_vm9, %v1915_v33, %v1914_v30  ;;  %v1950_v47 = vsel %vm1811_vm9, %v1949_v63, %v1948_v43  ;;  %v1984_v0 = vsel %vm1811_vm9, %v1983_v40, %v1982_v38 }
 0x213   : > { %v4124_v62 = vadd.f32 %v3963_v32, %v1440_v2  ;;  %v2018_v35 = vsel %vm1811_vm9, %v2017_v39, %v2016_v53  ;;  %v2272_v17 = vsel %vm1811_vm9, %v2271_v8, %v2270_v5  ;;  %v4129_v4 = vsel %vm1811_vm9, %v2305_v42, %v2304_v51 }
 0x214   : > { %v2102_v59 = vrot.slane %v4118_v57, 5  ;;  %v2136_v29 = vrot.slane %v4118_v57, 6  ;;  %v2170_v30 = vrot.slane %v4118_v57, 7  ;;  %v2205_v43 = vsel %vm1814_vm10, %v4118_v57, %v2204_v22 }
 0x215   : > { %4876 = vst [vmem:[#allocation6_spill] sm:$0xff] %v4124_v62  ;;  %v2670_v40 = vpop.f32.mrb[8].mxu0  ;;  %v2053_v32 = vrot.slane %v4124_v62, 4  ;;  %v2239_v38 = vrot.slane %v4118_v57, 1  ;;  %v1848_v53 = vrot.slane %v4124_v62, 6  ;;  %v1882_v5 = vrot.slane %v4124_v62, 7 }
 0x216   : > { %v1321_v51 = vadd.f32 %v2670_v40, %v4022_v13  ;;  %v1315_v41 = vpop.f32.mrb[9].mxu0  ;;  %v2103_v25 = vsel %vm1814_vm10, %v2102_v59, %v2101_v12  ;;  %v2137_v21 = vsel %vm1814_vm10, %v2136_v29, %v2135_v16  ;;  %v2171_v33 = vsel %vm1814_vm10, %v2170_v30, %v2169_v15 }
 0x217   : > { %v1316_v22 = vadd.f32 %v4022_v13, %v1315_v41  ;;  %v2054_v63 = vsel %vm1814_vm10, %v2053_v32, %v2052_v23  ;;  %v2240_v2 = vsel %vm1814_vm10, %v2239_v38, %v2238_v55  ;;  %v1849_v39 = vsel %vm1814_vm10, %v1848_v53, %v1847_v52 }
 0x218   : > { %v1443_v8 = vmax.f32 %v1321_v51, 0.0  ;;  %v1883_v42 = vsel %vm1814_vm10, %v1882_v5, %v1881_v27  ;;  %v1917_v40 = vsel %vm1814_vm10, %v4124_v62, %v1916_v45  ;;  %v1951_v12 = vrot.slane %v4124_v62, 1 }
 0x219   : > { %v1442_v59 = vmax.f32 %v1316_v22, 0.0  ;;  %v1985_v16 = vrot.slane %v4124_v62, 2  ;;  %v2019_v15 = vrot.slane %v4124_v62, 3  ;;  %v2273_v29 = vrot.slane %v4118_v57, 2 }
 0x21a   : > { %v4156_v23 = vadd.f32 %v3972_v1, %v1443_v8  ;;  %v1952_v55 = vsel %vm1814_vm10, %v1951_v12, %v1950_v47  ;;  %v2307_v52 = vrot.slane %v4118_v57, 3 }
 0x21b   : > { %v4162_v45 = vadd.f32 %v3975_v36, %v1442_v59  ;;  %v1986_v30 = vsel %vm1814_vm10, %v1985_v16, %v1984_v0  ;;  %v2020_v32 = vsel %vm1814_vm10, %v2019_v15, %v2018_v35  ;;  %v2274_v38 = vsel %vm1814_vm10, %v2273_v29, %v2272_v17 }
 0x21c   : > { %v2104_v53 = vrot.slane %v4156_v23, 4  ;;  %v2138_v1 = vrot.slane %v4156_v23, 5  ;;  %v2172_v5 = vrot.slane %v4156_v23, 6  ;;  %v2206_v47 = vrot.slane %v4156_v23, 7 }
 0x21d   : > { %4877 = vst [vmem:[#allocation8_spill] sm:$0xff] %v4162_v45  ;;  %v2673_v51 = vpop.f32.mrb[10].mxu0  ;;  %v2055_v41 = vrot.slane %v4162_v45, 3  ;;  %v2241_v36 = vsel %vm1817_vm11, %v4156_v23, %v2240_v2  ;;  %v1850_v0 = vrot.slane %v4162_v45, 5  ;;  %v1884_v35 = vrot.slane %v4162_v45, 6 }
 0x21e   : > { %v1331_v17 = vadd.f32 %v2673_v51, %v4022_v13  ;;  %v1325_v22 = vpop.f32.mrb[11].mxu0  ;;  %v2105_v8 = vsel %vm1817_vm11, %v2104_v53, %v2103_v25  ;;  %v2139_v12 = vsel %vm1817_vm11, %v2138_v1, %v2137_v21  ;;  %v2173_v59 = vsel %vm1817_vm11, %v2172_v5, %v2171_v33 }
 0x21f   : > { %v1326_v16 = vadd.f32 %v4022_v13, %v1325_v22  ;;  %v2056_v15 = vsel %vm1817_vm11, %v2055_v41, %v2054_v63  ;;  %v2207_v29 = vsel %vm1817_vm11, %v2206_v47, %v2205_v43  ;;  %v1851_v2 = vsel %vm1817_vm11, %v1850_v0, %v1849_v39 }
 0x220   : > { %v1445_v27 = vmax.f32 %v1331_v17, 0.0  ;;  %v1885_v62 = vsel %vm1817_vm11, %v1884_v35, %v1883_v42  ;;  %v1918_v51 = vrot.slane %v4162_v45, 7  ;;  %v1953_v25 = vsel %vm1817_vm11, %v4162_v45, %v1952_v55 }
 0x221   : > { %v1444_v53 = vmax.f32 %v1326_v16, 0.0  ;;  %v1987_v21 = vrot.slane %v4162_v45, 1  ;;  %v2021_v33 = vrot.slane %v4162_v45, 2  ;;  %v2275_v1 = vrot.slane %v4156_v23, 1 }
 0x222   : > { %v4192_v63 = vadd.f32 %v3977_v24, %v1445_v27  ;;  %v1919_v43 = vsel %vm1817_vm11, %v1918_v51, %v1917_v40  ;;  %v2308_v39 = vsel %vm1814_vm10, %v2307_v52, %v4129_v4  ;;  %v2309_v42 = vrot.slane %v4156_v23, 2 }
 0x223   : > { %v4199_v5 = vadd.f32 %v3979_v49, %v1444_v53  ;;  %v1988_v55 = vsel %vm1817_vm11, %v1987_v21, %v1986_v30  ;;  %v2022_v47 = vsel %vm1817_vm11, %v2021_v33, %v2020_v32  ;;  %v2276_v41 = vsel %vm1817_vm11, %v2275_v1, %v2274_v38 }
 0x224   : > { %v2106_v0 = vrot.slane %v4192_v63, 3  ;;  %v2140_v24 = vrot.slane %v4192_v63, 4  ;;  %v2174_v40 = vrot.slane %v4192_v63, 5  ;;  %v2208_v27 = vrot.slane %v4192_v63, 6 }
 0x225   : > { %v2676_v4 = vpop.f32.mrb[12].mxu0  ;;  %v2057_v52 = vrot.slane %v4199_v5, 2  ;;  %v2242_v49 = vrot.slane %v4192_v63, 7  ;;  %v1852_v30 = vrot.slane %v4199_v5, 4  ;;  %v1886_v32 = vrot.slane %v4199_v5, 5 }
 0x226   : > { %v1341_v38 = vadd.f32 %v2676_v4, %v4022_v13  ;;  %v1335_v35 = vpop.f32.mrb[13].mxu0  ;;  %v2107_v17 = vsel %vm1820_vm12, %v2106_v0, %v2105_v8  ;;  %v2141_v22 = vsel %vm1820_vm12, %v2140_v24, %v2139_v12  ;;  %v2175_v16 = vsel %vm1820_vm12, %v2174_v40, %v2173_v59 }
 0x227   : > { %v1336_v51 = vadd.f32 %v4022_v13, %v1335_v35  ;;  %v2058_v53 = vsel %vm1820_vm12, %v2057_v52, %v2056_v15  ;;  %v2209_v21 = vsel %vm1820_vm12, %v2208_v27, %v2207_v29  ;;  %v2243_v33 = vsel %vm1820_vm12, %v2242_v49, %v2241_v36 }
 0x228   : > { %v1447_v1 = vmax.f32 %v1341_v38, 0.0  ;;  %v1853_v45 = vsel %vm1820_vm12, %v1852_v30, %v1851_v2  ;;  %v1887_v4 = vsel %vm1820_vm12, %v1886_v32, %v1885_v62  ;;  %v1920_v54 = vrot.slane %v4199_v5, 6 }
 0x229   : > { %v1446_v8 = vmax.f32 %v1336_v51, 0.0  ;;  %v1954_v12 = vrot.slane %v4199_v5, 7  ;;  %v1989_v59 = vsel %vm1820_vm12, %v4199_v5, %v1988_v55  ;;  %v2023_v0 = vrot.slane %v4199_v5, 1 }
 0x22a   : > { %v4228_v15 = vadd.f32 %v3981_v11, %v1447_v1  ;;  %v1921_v36 = vsel %vm1820_vm12, %v1920_v54, %v1919_v43  ;;  %v4233_v29 = vsel %vm1820_vm12, %v4192_v63, %v2276_v41  ;;  %v2310_v62 = vsel %vm1817_vm11, %v2309_v42, %v2308_v39 }
 0x22b   : > { %v4237_v2 = vadd.f32 %v3983_v18, %v1446_v8  ;;  %v1955_v24 = vsel %vm1820_vm12, %v1954_v12, %v1953_v25  ;;  %v2024_v55 = vsel %vm1820_vm12, %v2023_v0, %v2022_v47  ;;  %v2311_v40 = vrot.slane %v4192_v63, 1 }
 0x22c   : > { %v2108_v11 = vrot.slane %v4228_v15, 2  ;;  %v2142_v27 = vrot.slane %v4228_v15, 3  ;;  %v2176_v54 = vrot.slane %v4228_v15, 4  ;;  %v2210_v43 = vrot.slane %v4228_v15, 5 }
 0x22d   : > { %v2679_v41 = vpop.f32.mrb[14].mxu0  ;;  %v2059_v39 = vrot.slane %v4237_v2, 1  ;;  %v2244_v18 = vrot.slane %v4228_v15, 6  ;;  %v1854_v42 = vrot.slane %v4237_v2, 3  ;;  %v1888_v25 = vrot.slane %v4237_v2, 4 }
 0x22e   : > { %v1351_v47 = vadd.f32 %v2679_v41, %v4022_v13  ;;  %v1345_v52 = vpop.f32.mrb[15].mxu0  ;;  %v2109_v49 = vsel %vm1823_vm13, %v2108_v11, %v2107_v17  ;;  %v2143_v30 = vsel %vm1823_vm13, %v2142_v27, %v2141_v22  ;;  %v2177_v32 = vsel %vm1823_vm13, %v2176_v54, %v2175_v16 }
 0x22f   : > { %v1346_v38 = vadd.f32 %v4022_v13, %v1345_v52  ;;  %v2060_v35 = vsel %vm1823_vm13, %v2059_v39, %v2058_v53  ;;  %v2211_v51 = vsel %vm1823_vm13, %v2210_v43, %v2209_v21  ;;  %v2245_v1 = vsel %vm1823_vm13, %v2244_v18, %v2243_v33 }
 0x230   : > { %v1449_v8 = vmax.f32 %v1351_v47, 0.0  ;;  %v1855_v12 = vsel %vm1823_vm13, %v1854_v42, %v1853_v45  ;;  %v1889_v0 = vsel %vm1823_vm13, %v1888_v25, %v1887_v4  ;;  %v1922_v41 = vrot.slane %v4237_v2, 5 }
 0x231   : > { %v1448_v17 = vmax.f32 %v1346_v38, 0.0  ;;  %v1956_v22 = vrot.slane %v4237_v2, 6  ;;  %v1990_v16 = vrot.slane %v4237_v2, 7  ;;  %v2025_v11 = vsel %vm1823_vm13, %v4237_v2, %v2024_v55 }
 0x232   : > { %v4266_v53 = vadd.f32 %v3985_v58, %v1449_v8  ;;  %v1923_v21 = vsel %vm1823_vm13, %v1922_v41, %v1921_v36  ;;  %v2278_v33 = vrot.slane %v4228_v15, 7  ;;  %v2312_v45 = vsel %vm1820_vm12, %v2311_v40, %v2310_v62 }
 0x233   : > { %v4272_v4 = vadd.f32 %v3987_v60, %v1448_v17  ;;  %v1957_v27 = vsel %vm1823_vm13, %v1956_v22, %v1955_v24  ;;  %v1991_v54 = vsel %vm1823_vm13, %v1990_v16, %v1989_v59  ;;  %v2313_v43 = vsel %vm1823_vm13, %v4228_v15, %v2312_v45 }
 0x234   : > { %v2110_v55 = vrot.slane %v4266_v53, 1  ;;  %v2144_v58 = vrot.slane %v4266_v53, 2  ;;  %v2178_v36 = vrot.slane %v4266_v53, 3  ;;  %v2212_v39 = vrot.slane %v4266_v53, 4 }
 0x235   : > { %v2682_v18 = vpop.f32.mrb[16].mxu0  ;;  %v2061_v60 = vsel %vm1826_vm14, %v4272_v4, %v2060_v35  ;;  %v2246_v62 = vrot.slane %v4266_v53, 5  ;;  %v1856_v24 = vrot.slane %v4272_v4, 2  ;;  %v1890_v59 = vrot.slane %v4272_v4, 3 }
 0x236   : > { %v1361_v40 = vadd.f32 %v2682_v18, %v4022_v13  ;;  %2076 = vrot.lane.b32.xlu0 %v2061_v60, %s2833_s19  ;;  %v1355_v42 = vpop.f32.mrb[17].mxu0  ;;  %v2111_v25 = vsel %vm1826_vm14, %v2110_v55, %v2109_v49  ;;  %v2145_v47 = vsel %vm1826_vm14, %v2144_v58, %v2143_v30  ;;  %v2179_v52 = vsel %vm1826_vm14, %v2178_v36, %v2177_v32 }
 0x237   : > { %v1356_v38 = vadd.f32 %v4022_v13, %v1355_v42  ;;  %v4294_v35 = vsel %vm1826_vm14, %v2212_v39, %v2211_v51  ;;  %v4297_v8 = vsel %vm1826_vm14, %v2246_v62, %v2245_v1  ;;  %v4300_v41 = vsel %vm1826_vm14, %v1856_v24, %v1855_v12 }
 0x238   : > { %v1451_v17 = vmax.f32 %v1361_v40, 0.0  ;;  %v4303_v22 = vsel %vm1826_vm14, %v1890_v59, %v1889_v0  ;;  %v1924_v49 = vrot.slane %v4272_v4, 4  ;;  %v1958_v30 = vrot.slane %v4272_v4, 5 }
 0x239   : > { %v1450_v32 = vmax.f32 %v1356_v38, 0.0  ;;  %v1992_v16 = vrot.slane %v4272_v4, 6  ;;  %v2026_v51 = vrot.slane %v4272_v4, 7  ;;  %v2279_v1 = vsel %vm1823_vm13, %v2278_v33, %v4233_v29 }
 0x23a   : > { %v4312_v45 = vadd.f32 %v3989_v46, %v1451_v17  ;;  %2126 = vrot.lane.b32.xlu0 %v2111_v25, %s2834_s20  ;;  %v4316_v12 = vsel %vm1826_vm14, %v1924_v49, %v1923_v21  ;;  %v4319_v0 = vsel %vm1826_vm14, %v1958_v30, %v1957_v27  ;;  %v2280_v55 = vrot.slane %v4266_v53, 6 }
 0x23b   : > { %v4323_v58 = vadd.f32 %v3991_v61, %v1450_v32  ;;  %v4326_v36 = vsel %vm1826_vm14, %v1992_v16, %v1991_v54  ;;  %v4329_v46 = vsel %vm1826_vm14, %v2026_v51, %v2025_v11  ;;  %v2314_v29 = vrot.slane %v4266_v53, 7 }
 0x23c   : > { %v4333_v33 = vsel %vm1826_vm14, %v2280_v55, %v2279_v1  ;;  %v4878_v21 = vrot.slane %v4029_v3, 7  ;;  %v4879_v27 = vrot.slane %v4045_v14, 6  ;;  %v2339_v61 = vrot.slane %v4082_v50, 5 }
 0x23d   : > { %v2341_v18 = vrot.slane %v4118_v57, 4  ;;  %v2685_v54 = vpop.f32.mrb[18].mxu0  ;;  %v4343_v60 = vsel %vm1826_vm14, %v2314_v29, %v2313_v43  ;;  %v2343_v11 = vrot.slane %v4156_v23, 3  ;;  %v2345_v62 = vrot.slane %v4192_v63, 2 }
 0x23e   : > { %v2338_v39 = vsel %vm1808_vm8, %v4879_v27, %v4878_v21  ;;  %v2347_v24 = vrot.slane %v4228_v15, 1  ;;  %v1371_v3 = vadd.f32 %v2685_v54, %v4022_v13  ;;  %2160 = vrot.lane.b32.xlu0 %v2145_v47, %s2835_s21  ;;  %v1365_v14 = vpop.f32.mrb[19].mxu0  ;;  %v2062_v57 = vrot.slane %v4323_v58, 7 }
 0x23f   : > { %v2340_v50 = vsel %vm1811_vm9, %v2339_v61, %v2338_v39  ;;  %v2146_v59 = vrot.slane %v4312_v45, 1  ;;  %v1366_v43 = vadd.f32 %v4022_v13, %v1365_v14  ;;  %v2180_v63 = vrot.slane %v4312_v45, 2 }
 0x240   : > { %v2342_v23 = vsel %vm1814_vm10, %v2341_v18, %v2340_v50  ;;  %v2214_v15 = vrot.slane %v4312_v45, 3  ;;  %v1453_v40 = vmax.f32 %v1371_v3, 0.0  ;;  %v2248_v25 = vrot.slane %v4312_v45, 4 }
 0x241   : > { %v2344_v42 = vsel %vm1817_vm11, %v2343_v11, %v2342_v23  ;;  %v1858_v47 = vrot.slane %v4323_v58, 1  ;;  %v1452_v38 = vmax.f32 %v1366_v43, 0.0  ;;  %v1892_v49 = vrot.slane %v4323_v58, 2 }
 0x242   : > { %v2346_v17 = vsel %vm1820_vm12, %v2345_v62, %v2344_v42  ;;  %v1926_v30 = vrot.slane %v4323_v58, 3  ;;  %v4364_v32 = vadd.f32 %v3993_v10, %v1453_v40  ;;  %2194 = vrot.lane.b32.xlu0 %v2179_v52, %s2836_s22  ;;  %v1960_v51 = vrot.slane %v4323_v58, 4 }
 0x243   : > { %v2348_v16 = vsel %vm1823_vm13, %v2347_v24, %v2346_v17  ;;  %v1994_v1 = vrot.slane %v4323_v58, 5  ;;  %v4371_v55 = vadd.f32 %v3995_v34, %v1452_v38  ;;  %v2028_v21 = vrot.slane %v4323_v58, 6 }
 0x244   : > { %v4375_v29 = vsel %vm1826_vm14, %v4266_v53, %v2348_v16  ;;  %v2282_v10 = vrot.slane %v4312_v45, 5  ;;  %v2112_v27 = vrot.slane %v4364_v32, 7  ;;  %v2147_v52 = vsel %vm1808_vm8, %v4364_v32, %v2146_v59 }
 0x245   : > { %v2181_v39 = vrot.slane %v4364_v32, 1  ;;  %v2215_v61 = vrot.slane %v4364_v32, 2  ;;  %v2688_v18 = vpop.f32.mrb[20].mxu0  ;;  %v2063_v34 = vrot.slane %v4371_v55, 6  ;;  %v2249_v54 = vrot.slane %v4364_v32, 3 }
 0x246   : > { %v1859_v53 = vsel %vm1808_vm8, %v4371_v55, %v1858_v47  ;;  %v1893_v11 = vrot.slane %v4371_v55, 1  ;;  %v1381_v62 = vadd.f32 %v2688_v18, %v4022_v13  ;;  %2228 = vrot.lane.b32.xlu0 %v4294_v35, %s2837_s23  ;;  %v1375_v24 = vpop.f32.mrb[21].mxu0  ;;  %v2113_v3 = vsel %vm1808_vm8, %v2112_v27, %v4312_v45 }
 0x247   : > { %v2182_v14 = vsel %vm1808_vm8, %v2181_v39, %v2180_v63  ;;  %v2216_v50 = vsel %vm1808_vm8, %v2215_v61, %v2214_v15  ;;  %v1376_v59 = vadd.f32 %v4022_v13, %v1375_v24  ;;  %v2064_v43 = vsel %vm1808_vm8, %v2063_v34, %v2062_v57 }
 0x248   : > { %v2250_v23 = vsel %vm1808_vm8, %v2249_v54, %v2248_v25  ;;  %v1894_v40 = vsel %vm1808_vm8, %v1893_v11, %v1892_v49  ;;  %v1455_v42 = vmax.f32 %v1381_v62, 0.0  ;;  %v1927_v47 = vrot.slane %v4371_v55, 2 }
 0x249   : > { %v1961_v35 = vrot.slane %v4371_v55, 3  ;;  %v1995_v38 = vrot.slane %v4371_v55, 4  ;;  %v1454_v17 = vmax.f32 %v1376_v59, 0.0  ;;  %v2029_v63 = vrot.slane %v4371_v55, 5 }
 0x24a   : > { %v2283_v15 = vrot.slane %v4364_v32, 4  ;;  %v2316_v16 = vrot.slane %v4312_v45, 6  ;;  %v4407_v57 = vadd.f32 %v3997_v31, %v1455_v42  ;;  %2262 = vrot.lane.b32.xlu0 %v4297_v8, %s2838_s25  ;;  %v1928_v25 = vsel %vm1808_vm8, %v1927_v47, %v1926_v30 }
 0x24b   : > { %v1962_v49 = vsel %vm1808_vm8, %v1961_v35, %v1960_v51  ;;  %v1996_v27 = vsel %vm1808_vm8, %v1995_v38, %v1994_v1  ;;  %v4415_v39 = vadd.f32 %v3999_v26, %v1454_v17  ;;  %v2030_v61 = vsel %vm1808_vm8, %v2029_v63, %v2028_v21 }
 0x24c   : > { %v2284_v18 = vsel %vm1808_vm8, %v2283_v15, %v2282_v10  ;;  %v2317_v31 = vrot.slane %v4364_v32, 5  ;;  %v2114_v34 = vrot.slane %v4407_v57, 6  ;;  %v2148_v54 = vrot.slane %v4407_v57, 7 }
 0x24d   : > { %v2183_v8 = vsel %vm1811_vm9, %v4407_v57, %v2182_v14  ;;  %v2217_v30 = vrot.slane %v4407_v57, 1  ;;  %v2691_v51 = vpop.f32.mrb[22].mxu0  ;;  %v2065_v1 = vrot.slane %v4415_v39, 5  ;;  %v2251_v26 = vrot.slane %v4407_v57, 2 }
 0x24e   : > { %v1860_v21 = vrot.slane %v4415_v39, 7  ;;  %v1895_v10 = vsel %vm1811_vm9, %v4415_v39, %v1894_v40  ;;  %v1391_v11 = vadd.f32 %v2691_v51, %v4022_v13  ;;  %1872 = vrot.lane.b32.xlu0 %v4300_v41, %s2830_s24  ;;  %v1385_v62 = vpop.f32.mrb[23].mxu0  ;;  %v2115_v24 = vsel %vm1811_vm9, %v2114_v34, %v2113_v3 }
 0x24f   : > { %v2149_v14 = vsel %vm1811_vm9, %v2148_v54, %v2147_v52  ;;  %v2218_v59 = vsel %vm1811_vm9, %v2217_v30, %v2216_v50  ;;  %v1386_v42 = vadd.f32 %v4022_v13, %v1385_v62  ;;  %v2066_v47 = vsel %vm1811_vm9, %v2065_v1, %v2064_v43 }
 0x250   : > { %v2252_v35 = vsel %vm1811_vm9, %v2251_v26, %v2250_v23  ;;  %v1861_v40 = vsel %vm1811_vm9, %v1860_v21, %v1859_v53  ;;  %v1457_v38 = vmax.f32 %v1391_v11, 0.0  ;;  %v1929_v17 = vrot.slane %v4415_v39, 1 }
 0x251   : > { %v1963_v41 = vrot.slane %v4415_v39, 2  ;;  %v1997_v63 = vrot.slane %v4415_v39, 3  ;;  %v1456_v3 = vmax.f32 %v1386_v42, 0.0  ;;  %v2031_v52 = vrot.slane %v4415_v39, 4 }
 0x252   : > { %v2285_v50 = vrot.slane %v4407_v57, 3  ;;  %v2318_v15 = vsel %vm1808_vm8, %v2317_v31, %v2316_v16  ;;  %v4447_v43 = vadd.f32 %v4001_v19, %v1457_v38  ;;  %1906 = vrot.lane.b32.xlu0 %v4303_v22, %s2839_s26  ;;  %v1930_v53 = vsel %vm1811_vm9, %v1929_v17, %v1928_v25 }
 0x253   : > { %v1964_v23 = vsel %vm1811_vm9, %v1963_v41, %v1962_v49  ;;  %v1998_v34 = vsel %vm1811_vm9, %v1997_v63, %v1996_v27  ;;  %v4455_v54 = vadd.f32 %v4003_v6, %v1456_v3  ;;  %v2032_v30 = vsel %vm1811_vm9, %v2031_v52, %v2030_v61 }
 0x254   : > { %v2286_v16 = vsel %vm1811_vm9, %v2285_v50, %v2284_v18  ;;  %v2319_v19 = vrot.slane %v4407_v57, 4  ;;  %v2116_v31 = vrot.slane %v4447_v43, 5  ;;  %v2150_v51 = vrot.slane %v4447_v43, 6 }
 0x255   : > { %v2184_v22 = vrot.slane %v4447_v43, 7  ;;  %v2219_v25 = vsel %vm1814_vm10, %v4447_v43, %v2218_v59  ;;  %v2694_v49 = vpop.f32.mrb[24].mxu0  ;;  %v2067_v27 = vrot.slane %v4455_v54, 4  ;;  %v2253_v6 = vrot.slane %v4447_v43, 1 }
 0x256   : > { %v1862_v61 = vrot.slane %v4455_v54, 6  ;;  %v1896_v18 = vrot.slane %v4455_v54, 7  ;;  %v1401_v1 = vadd.f32 %v2694_v49, %v4022_v13  ;;  %1940 = vrot.lane.b32.xlu0 %v4316_v12, %s2832_s12  ;;  %v1395_v26 = vpop.f32.mrb[25].mxu0  ;;  %v2117_v21 = vsel %vm1814_vm10, %v2116_v31, %v2115_v24 }
 0x257   : > { %v2151_v11 = vsel %vm1814_vm10, %v2150_v51, %v2149_v14  ;;  %v2185_v62 = vsel %vm1814_vm10, %v2184_v22, %v2183_v8  ;;  %v1396_v59 = vadd.f32 %v4022_v13, %v1395_v26  ;;  %v2068_v42 = vsel %vm1814_vm10, %v2067_v27, %v2066_v47 }
 0x258   : > { %v2254_v38 = vsel %vm1814_vm10, %v2253_v6, %v2252_v35  ;;  %v1863_v17 = vsel %vm1814_vm10, %v1862_v61, %v1861_v40  ;;  %v1459_v41 = vmax.f32 %v1401_v1, 0.0  ;;  %v1897_v63 = vsel %vm1814_vm10, %v1896_v18, %v1895_v10 }
 0x259   : > { %v1931_v12 = vsel %vm1814_vm10, %v4455_v54, %v1930_v53  ;;  %v1965_v24 = vrot.slane %v4455_v54, 1  ;;  %v1458_v3 = vmax.f32 %v1396_v59, 0.0  ;;  %v1999_v14 = vrot.slane %v4455_v54, 2 }
 0x25a   : > { %v2033_v8 = vrot.slane %v4455_v54, 3  ;;  %v2287_v52 = vrot.slane %v4447_v43, 2  ;;  %v4487_v47 = vadd.f32 %v4005_v20, %v1459_v41  ;;  %1974 = vrot.lane.b32.xlu0 %v4319_v0, %s2840_s27  ;;  %v2320_v35 = vsel %vm1811_vm9, %v2319_v19, %v2318_v15 }
 0x25b   : > { %v1966_v10 = vsel %vm1814_vm10, %v1965_v24, %v1964_v23  ;;  %v2321_v40 = vrot.slane %v4447_v43, 3  ;;  %v4495_v50 = vadd.f32 %v4007_v44, %v1458_v3  ;;  %v2000_v53 = vsel %vm1814_vm10, %v1999_v14, %v1998_v34 }
 0x25c   : > { %v2034_v31 = vsel %vm1814_vm10, %v2033_v8, %v2032_v30  ;;  %v2288_v20 = vsel %vm1814_vm10, %v2287_v52, %v2286_v16  ;;  %v2118_v51 = vrot.slane %v4487_v47, 4  ;;  %v2152_v22 = vrot.slane %v4487_v47, 5 }
 0x25d   : > { %v2186_v0 = vrot.slane %v4487_v47, 6  ;;  %v2220_v23 = vrot.slane %v4487_v47, 7  ;;  %v2697_v15 = vpop.f32.mrb[26].mxu0  ;;  %v2069_v19 = vrot.slane %v4495_v50, 3  ;;  %v2255_v44 = vsel %vm1817_vm11, %v4487_v47, %v2254_v38 }
 0x25e   : > { %v1864_v34 = vrot.slane %v4495_v50, 5  ;;  %v1898_v30 = vrot.slane %v4495_v50, 6  ;;  %v1411_v16 = vadd.f32 %v2697_v15, %v4022_v13  ;;  %2008 = vrot.lane.b32.xlu0 %v4326_v36, %s2841_s28  ;;  %v1405_v49 = vpop.f32.mrb[27].mxu0  ;;  %v2119_v27 = vsel %vm1817_vm11, %v2118_v51, %v2117_v21 }
 0x25f   : > { %v2153_v6 = vsel %vm1817_vm11, %v2152_v22, %v2151_v11  ;;  %v2187_v61 = vsel %vm1817_vm11, %v2186_v0, %v2185_v62  ;;  %v1406_v18 = vadd.f32 %v4022_v13, %v1405_v49  ;;  %v2070_v1 = vsel %vm1817_vm11, %v2069_v19, %v2068_v42 }
 0x260   : > { %v2221_v26 = vsel %vm1817_vm11, %v2220_v23, %v2219_v25  ;;  %v1865_v59 = vsel %vm1817_vm11, %v1864_v34, %v1863_v17  ;;  %v1461_v38 = vmax.f32 %v1411_v16, 0.0  ;;  %v1899_v41 = vsel %vm1817_vm11, %v1898_v30, %v1897_v63 }
 0x261   : > { %v1932_v36 = vrot.slane %v4495_v50, 7  ;;  %v1967_v21 = vsel %vm1817_vm11, %v4495_v50, %v1966_v10  ;;  %v1460_v24 = vmax.f32 %v1406_v18, 0.0  ;;  %v2001_v11 = vrot.slane %v4495_v50, 1 }
 0x262   : > { %v2035_v62 = vrot.slane %v4495_v50, 2  ;;  %v2289_v3 = vrot.slane %v4487_v47, 1  ;;  %v4527_v42 = vadd.f32 %v4009_v9, %v1461_v38  ;;  %2042 = vrot.lane.b32.xlu0 %v4329_v46, %s2842_s29  ;;  %v2322_v17 = vsel %vm1814_vm10, %v2321_v40, %v2320_v35 }
 0x263   : > { %v1933_v25 = vsel %vm1817_vm11, %v1932_v36, %v1931_v12  ;;  %v2323_v63 = vrot.slane %v4487_v47, 2  ;;  %v4535_v14 = vadd.f32 %v4011_v28, %v1460_v24  ;;  %v2002_v8 = vsel %vm1817_vm11, %v2001_v11, %v2000_v53 }
 0x264   : > { %v2036_v52 = vsel %vm1817_vm11, %v2035_v62, %v2034_v31  ;;  %v2290_v9 = vsel %vm1817_vm11, %v2289_v3, %v2288_v20  ;;  %v2120_v10 = vrot.slane %v4527_v42, 3  ;;  %v2154_v51 = vrot.slane %v4527_v42, 4 }
 0x265   : > { %v2188_v46 = vrot.slane %v4527_v42, 5  ;;  %v2222_v12 = vrot.slane %v4527_v42, 6  ;;  %v2700_v35 = vpop.f32.mrb[28].mxu0  ;;  %v2071_v40 = vrot.slane %v4535_v14, 2  ;;  %v2256_v28 = vrot.slane %v4527_v42, 7 }
 0x266   : > { %v1866_v22 = vrot.slane %v4535_v14, 4  ;;  %v1900_v53 = vrot.slane %v4535_v14, 5  ;;  %v1421_v31 = vadd.f32 %v2700_v35, %v4022_v13  ;;  %2296 = vrot.lane.b32.xlu0 %v4333_v33, %s2843_s30  ;;  %v1415_v20 = vpop.f32.mrb[29].mxu0  ;;  %v2121_v0 = vsel %vm1820_vm12, %v2120_v10, %v2119_v27 }
 0x267   : > { %v2155_v23 = vsel %vm1820_vm12, %v2154_v51, %v2153_v6  ;;  %v2189_v15 = vsel %vm1820_vm12, %v2188_v46, %v2187_v61  ;;  %v1416_v19 = vadd.f32 %v4022_v13, %v1415_v20  ;;  %v2072_v34 = vsel %vm1820_vm12, %v2071_v40, %v2070_v1 }
 0x268   : > { %v2223_v30 = vsel %vm1820_vm12, %v2222_v12, %v2221_v26  ;;  %v2257_v16 = vsel %vm1820_vm12, %v2256_v28, %v2255_v44  ;;  %v1463_v49 = vmax.f32 %v1421_v31, 0.0  ;;  %v1867_v18 = vsel %vm1820_vm12, %v1866_v22, %v1865_v59 }
 0x269   : > { %v1901_v33 = vsel %vm1820_vm12, %v1900_v53, %v1899_v41  ;;  %v1934_v38 = vrot.slane %v4535_v14, 6  ;;  %v1462_v27 = vmax.f32 %v1416_v19, 0.0  ;;  %v1968_v6 = vrot.slane %v4535_v14, 7 }
 0x26a   : > { %v2003_v61 = vsel %vm1820_vm12, %v4535_v14, %v2002_v8  ;;  %v2037_v13 = vrot.slane %v4535_v14, 1  ;;  %v4566_v1 = vadd.f32 %v4013_v56, %v1463_v49  ;;  %2330 = vrot.lane.b32.xlu0 %v4343_v60, %s2844_s5  ;;  %v4573_v26 = vsel %vm1820_vm12, %v4527_v42, %v2290_v9  ;;  %v2804_v8 = vld [vmem:[%s4753_s2] ss:$0 sm:$0xff] }
 0x26b   : > { %v1935_v44 = vsel %vm1820_vm12, %v1934_v38, %v1933_v25  ;;  %v2324_v59 = vsel %vm1817_vm11, %v2323_v63, %v2322_v17  ;;  %v4577_v41 = vadd.f32 %v4015_v37, %v1462_v27  ;;  %v1969_v36 = vsel %vm1820_vm12, %v1968_v6, %v1967_v21 }
 0x26c   : > { %v2038_v56 = vsel %vm1820_vm12, %v2037_v13, %v2036_v52  ;;  %v2325_v24 = vrot.slane %v4527_v42, 1  ;;  %v2122_v11 = vrot.slane %v4566_v1, 2  ;;  %v2156_v60 = vrot.slane %v4566_v1, 3 }
 0x26d   : > { %v2190_v62 = vrot.slane %v4566_v1, 4  ;;  %v2224_v3 = vrot.slane %v4566_v1, 5  ;;  %v2703_v25 = vpop.f32.mrb[30].mxu0  ;;  %v2073_v17 = vrot.slane %v4577_v41, 1  ;;  %v2258_v37 = vrot.slane %v4566_v1, 6 }
 0x26e   : > { %v1868_v63 = vrot.slane %v4577_v41, 3  ;;  %v1902_v21 = vrot.slane %v4577_v41, 4  ;;  %v1431_v52 = vadd.f32 %v2804_v8, %v2703_v25  ;;  %2364 = vrot.lane.b32.xlu0 %v4375_v29, %s2845_s8  ;;  %v1425_v9 = vpop.f32.mrb[31].mxu0  ;;  %v2123_v10 = vsel %vm1823_vm13, %v2122_v11, %v2121_v0 }
 0x26f   : > { %v2157_v51 = vsel %vm1823_vm13, %v2156_v60, %v2155_v23  ;;  %v2191_v46 = vsel %vm1823_vm13, %v2190_v62, %v2189_v15  ;;  %v1426_v12 = vadd.f32 %v2804_v8, %v1425_v9  ;;  %v2074_v35 = vsel %vm1823_vm13, %v2073_v17, %v2072_v34 }
 0x270   : > { %v2225_v40 = vsel %vm1823_vm13, %v2224_v3, %v2223_v30  ;;  %v2259_v28 = vsel %vm1823_vm13, %v2258_v37, %v2257_v16  ;;  %v1465_v22 = vmax.f32 %v1431_v52, 0.0  ;;  %v1869_v53 = vsel %vm1823_vm13, %v1868_v63, %v1867_v18 }
 0x271   : > { %v1903_v31 = vsel %vm1823_vm13, %v1902_v21, %v1901_v33  ;;  %v1936_v29 = vrot.slane %v4577_v41, 5  ;;  %v1464_v20 = vmax.f32 %v1426_v12, 0.0  ;;  %v1970_v0 = vrot.slane %v4577_v41, 6 }
 0x272   : > { %v2004_v23 = vrot.slane %v4577_v41, 7  ;;  %v2039_v15 = vsel %vm1823_vm13, %v4577_v41, %v2038_v56  ;;  %v1790_v19 = vadd.f32 %v4017_v7, %v1465_v22  ;;  %v2292_v30 = vrot.slane %v4566_v1, 7 }
 0x273   : > { %v1937_v34 = vsel %vm1823_vm13, %v1936_v29, %v1935_v44  ;;  %v2326_v16 = vsel %vm1820_vm12, %v2325_v24, %v2324_v59  ;;  %v4613_v49 = vadd.f32 %v4024_v48, %v1464_v20  ;;  %v1971_v18 = vsel %vm1823_vm13, %v1970_v0, %v1969_v36 }
 0x274   : > { %v2005_v33 = vsel %vm1823_vm13, %v2004_v23, %v2003_v61  ;;  %v2327_v38 = vsel %vm1823_vm13, %v4566_v1, %v2326_v16  ;;  %v2124_v27 = vrot.slane %v1790_v19, 1  ;;  %v2158_v6 = vrot.slane %v1790_v19, 2 }
 0x275   : > { %v2192_v13 = vrot.slane %v1790_v19, 3  ;;  %v2226_v7 = vrot.slane %v1790_v19, 4  ;;  %v2075_v44 = vsel %vm1826_vm14, %v4613_v49, %v2074_v35  ;;  %v2260_v56 = vrot.slane %v1790_v19, 5 }
 0x276   : > { %v1870_v59 = vrot.slane %v4613_v49, 2  ;;  %v1904_v48 = vrot.slane %v4613_v49, 3  ;;  %2078 = vrot.lane.b32.xlu1 %v2075_v44, %s2833_s19  ;;  %v2125_v36 = vsel %vm1826_vm14, %v2124_v27, %v2123_v10  ;;  %v2159_v61 = vsel %vm1826_vm14, %v2158_v6, %v2157_v51 }
 0x277   : > { %v2193_v24 = vsel %vm1826_vm14, %v2192_v13, %v2191_v46  ;;  %v2227_v11 = vsel %vm1826_vm14, %v2226_v7, %v2225_v40  ;;  %v2261_v60 = vsel %vm1826_vm14, %v2260_v56, %v2259_v28  ;;  %v1938_v25 = vrot.slane %v4613_v49, 4  ;;  %v4880_v7 = vld [vmem:[#allocation3_spill] sm:$0xff]  ;;  %v4881_v56 = vld [vmem:[#allocation17_spill] sm:$0xff] }
 0x278   : > { %v1871_v62 = vsel %vm1826_vm14, %v1870_v59, %v1869_v53  ;;  %v1905_v3 = vsel %vm1826_vm14, %v1904_v48, %v1903_v31  ;;  %v1972_v17 = vrot.slane %v4613_v49, 5  ;;  %v2006_v37 = vrot.slane %v4613_v49, 6  ;;  %v4882_v48 = vld [vmem:[#allocation6_spill] sm:$0xff] }
 0x279   : > { %v2040_v63 = vrot.slane %v4613_v49, 7  ;;  %v2293_v21 = vsel %vm1823_vm13, %v2292_v30, %v4573_v26  ;;  %v1939_v8 = vsel %vm1826_vm14, %v1938_v25, %v1937_v34  ;;  %v2294_v52 = vrot.slane %v1790_v19, 6 }
 0x27a   : > { %v2328_v9 = vrot.slane %v1790_v19, 7  ;;  %v2350_v10 = vrot.slane %v4312_v45, 7  ;;  %2128 = vrot.lane.b32.xlu1 %v2125_v36, %s2834_s20  ;;  %v1973_v51 = vsel %vm1826_vm14, %v1972_v17, %v1971_v18  ;;  %v2007_v46 = vsel %vm1826_vm14, %v2006_v37, %v2005_v33 }
 0x27b   : > { %v2041_v12 = vsel %vm1826_vm14, %v2040_v63, %v2039_v15  ;;  %v2351_v35 = vrot.slane %v4364_v32, 6  ;;  %v2295_v40 = vsel %vm1826_vm14, %v2294_v52, %v2293_v21  ;;  %v2353_v28 = vrot.slane %v4407_v57, 5 }
 0x27c   : > { %v2329_v26 = vsel %vm1826_vm14, %v2328_v9, %v2327_v38  ;;  %v2355_v22 = vrot.slane %v4447_v43, 4  ;;  %v2357_v53 = vrot.slane %v4487_v47, 3  ;;  %v2359_v31 = vrot.slane %v4527_v42, 2 }
 0x27d   : > { %v2352_v45 = vsel %vm1808_vm8, %v2351_v35, %v2350_v10  ;;  %v2361_v20 = vrot.slane %v4566_v1, 1  ;;  %v1828_v42 = vrot.slane %v4371_v55, 7  ;;  %v1830_v23 = vrot.slane %v4415_v39, 6 }
 0x27e   : > { %v2354_v29 = vsel %vm1811_vm9, %v2353_v28, %v2352_v45  ;;  %2162 = vrot.lane.b32.xlu1 %v2159_v61, %s2835_s21  ;;  %v1832_v1 = vrot.slane %v4455_v54, 5  ;;  %v1834_v15 = vrot.slane %v4495_v50, 4  ;;  %v1836_v30 = vrot.slane %v4535_v14, 3  ;;  %v4883_v61 = vld [vmem:[#allocation8_spill] sm:$0xff] }
 0x27f   : > { %v2356_v32 = vsel %vm1814_vm10, %v2355_v22, %v2354_v29  ;;  %v1829_v34 = vsel %vm1808_vm8, %v1828_v42, %v4323_v58  ;;  %v1838_v18 = vrot.slane %v4577_v41, 2  ;;  %v1840_v55 = vrot.slane %v4613_v49, 1 }
 0x280   : > { %v2358_v0 = vsel %vm1817_vm11, %v2357_v53, %v2356_v32  ;;  %v1831_v16 = vsel %vm1811_vm9, %v1830_v23, %v1829_v34  ;;  %v1807_v44 = vrot.slane %v4880_v7, 7  ;;  %v1810_v59 = vrot.slane %v4881_v56, 6 }
 0x281   : > { %v2360_v57 = vsel %vm1820_vm12, %v2359_v31, %v2358_v0  ;;  %v1813_v36 = vrot.slane %v4882_v48, 5  ;;  %v1822_v17 = vrot.slane %v4237_v2, 2  ;;  %v1825_v63 = vrot.slane %v4272_v4, 1 }
 0x282   : > { %v2362_v43 = vsel %vm1823_vm13, %v2361_v20, %v2360_v57  ;;  %2196 = vrot.lane.b32.xlu1 %v2193_v24, %s2836_s22  ;;  %v1816_v24 = vrot.slane %v4883_v61, 4 }
 0x283   : > { %v2363_v47 = vsel %vm1826_vm14, %v1790_v19, %v2362_v43  ;;  %v1833_v19 = vsel %vm1814_vm10, %v1832_v1, %v1831_v16 }
 0x284   : > { %v1835_v39 = vsel %vm1817_vm11, %v1834_v15, %v1833_v19 }
 0x285   : > { %v1837_v54 = vsel %vm1820_vm12, %v1836_v30, %v1835_v39 }
 0x286   : > { %2230 = vrot.lane.b32.xlu1 %v2227_v11, %s2837_s23  ;;  %v1839_v50 = vsel %vm1823_vm13, %v1838_v18, %v1837_v54 }
 0x287   : > { %v4677_v58 = vsel %vm1826_vm14, %v1840_v55, %v1839_v50 }
 0x28a   : > { %2264 = vrot.lane.b32.xlu1 %v2261_v60, %s2838_s25  ;;  %v4884_v60 = vld [vmem:[#allocation2_spill] sm:$0xff] }
 0x28e   : > { %1874 = vrot.lane.b32.xlu1 %v1871_v62, %s2830_s24  ;;  %v1809_v62 = vsel %vm1808_vm8, %v1807_v44, %v4884_v60  ;;  %vm2395_vm8 = vcmask 654336   ;;  %s2575_s24 = sshll.u32 %s4890_s15, 4 }
 0x28f   : > { %v1812_v25 = vsel %vm1811_vm9, %v1810_v59, %v1809_v62  ;;  %vm2398_vm9 = vcmask 719872   ;;  %s4720_s11 = scalar_lea.vmem %s4755_s4, %s2575_s24 }
 0x290   : > { %v1815_v37 = vsel %vm1814_vm10, %v1813_v36, %v1812_v25  ;;  %vm2401_vm10 = vcmask 785408  }
 0x291   : > { %v1818_v21 = vsel %vm1817_vm11, %v1816_v24, %v1815_v37  ;;  %vm2404_vm11 = vcmask 850944  }
 0x292   : > { %1908 = vrot.lane.b32.xlu1 %v1905_v3, %s2839_s26  ;;  %v1819_v3 = vrot.slane %v4199_v5, 3 }
 0x294   : > { %v1821_v52 = vsel %vm1820_vm12, %v1819_v3, %v1818_v21  ;;  %vm2407_vm12 = vcmask 916480  }
 0x295   : > { %v1824_v9 = vsel %vm1823_vm13, %v1822_v17, %v1821_v52  ;;  %vm2410_vm13 = vcmask 982016  }
 0x296   : > { %1942 = vrot.lane.b32.xlu1 %v1939_v8, %s2832_s12  ;;  %v1827_v10 = vsel %vm1826_vm14, %v1825_v63, %v1824_v9 }
 0x29a   : > { %1976 = vrot.lane.b32.xlu1 %v1973_v51, %s2840_s27 }
 0x29e   : > { %2010 = vrot.lane.b32.xlu1 %v2007_v46, %s2841_s28 }
 0x2a2   : > { %2044 = vrot.lane.b32.xlu1 %v2041_v12, %s2842_s29 }
 0x2a6   : > { %2298 = vrot.lane.b32.xlu1 %v2295_v40, %s2843_s30 }
 0x2a8   : > { %v2077_v14 = vpop.permute.xlu0 %2076 }
 0x2aa   : > { %2332 = vrot.lane.b32.xlu1 %v2329_v26, %s2844_s5 }
 0x2ac   : > { %v2127_v41 = vpop.permute.xlu0 %2126 }
 0x2ae   : > { %2366 = vrot.lane.b32.xlu1 %v2363_v47, %s2845_s8 }
 0x2b0   : > { %v2161_v49 = vpop.permute.xlu0 %2160 }
 0x2b4   : > { %v2195_v33 = vpop.permute.xlu0 %2194 }
 0x2b8   : > { %v2229_v38 = vpop.permute.xlu0 %2228 }
 0x2bc   : > { %v2263_v27 = vpop.permute.xlu0 %2262 }
 0x2c0   : > { %v1873_v6 = vpop.permute.xlu0 %1872 }
 0x2c1   : > { %v2370_v5 = vsel %vm767_vm3, %v1827_v10, %v1873_v6 }
 0x2c4   : > { %v1907_v13 = vpop.permute.xlu0 %1906 }
 0x2c5   : > { %v2373_v2 = vsel %vm2372_vm15, %v2370_v5, %v1907_v13 }
 0x2c8   : > { %v1941_v11 = vpop.permute.xlu0 %1940 }
 0x2c9   : > { %v2375_v46 = vsel %vm1063_vm6, %v2373_v2, %v1941_v11 }
 0x2cc   : > { %v1975_v8 = vpop.permute.xlu0 %1974 }
 0x2cd   : > { %v2378_v4 = vsel %vm2377_vm0, %v2375_v46, %v1975_v8 }
 0x2d0   : > { %v2009_v51 = vpop.permute.xlu0 %2008 }
 0x2d1   : > { %v2381_v12 = vsel %vm2380_vm1, %v2378_v4, %v2009_v51 }
 0x2d4   : > { %v2043_v35 = vpop.permute.xlu0 %2042 }
 0x2d5   : > { %v2384_v40 = vsel %vm2383_vm2, %v2381_v12, %v2043_v35 }
 0x2d6   : > { %v2387_v26 = vsel %vm2386_vm4, %v2384_v40, %v2077_v14 }
 0x2d7   : > { %v2390_v28 = vsel %vm2389_vm5, %v2387_v26, %v2127_v41 }
 0x2d8   : > { %v2393_v22 = vsel %vm2392_vm7, %v2390_v28, %v2161_v49  ;;  %v2297_v45 = vpop.permute.xlu0 %2296 }
 0x2d9   : > { %v2396_v53 = vsel %vm2395_vm8, %v2393_v22, %v2195_v33 }
 0x2da   : > { %v2399_v31 = vsel %vm2398_vm9, %v2396_v53, %v2229_v38 }
 0x2db   : > { %v2402_v29 = vsel %vm2401_vm10, %v2399_v31, %v2263_v27 }
 0x2dc   : > { %v2331_v20 = vpop.permute.xlu0 %2330  ;;  %v2405_v32 = vsel %vm2404_vm11, %v2402_v29, %v2297_v45 }
 0x2dd   : > { %v2408_v0 = vsel %vm2407_vm12, %v2405_v32, %v2331_v20 }
 0x2e0   : > { %v2365_v57 = vpop.permute.xlu0 %2364 }
 0x2e1   : > { %v2411_v43 = vsel %vm2410_vm13, %v2408_v0, %v2365_v57 }
 0x2e2   : > { %2413 = vst [vmem:[%s4720_s11] sm:$0xff] %v2411_v43 }
 0x2e8   : > { %v2079_v47 = vpop.permute.xlu1 %2078 }
 0x2ec   : > { %v2129_v42 = vpop.permute.xlu1 %2128 }
 0x2f0   : > { %v2163_v23 = vpop.permute.xlu1 %2162 }
 0x2f4   : > { %v2197_v1 = vpop.permute.xlu1 %2196 }
 0x2f8   : > { %v2231_v15 = vpop.permute.xlu1 %2230 }
 0x2fc   : > { %v2265_v34 = vpop.permute.xlu1 %2264 }
 0x300   : > { %v1875_v30 = vpop.permute.xlu1 %1874 }
 0x301   : > { %v2371_v16 = vsel %vm767_vm3, %v4677_v58, %v1875_v30 }
 0x304   : > { %v1909_v18 = vpop.permute.xlu1 %1908 }
 0x305   : > { %v2374_v19 = vsel %vm2372_vm15, %v2371_v16, %v1909_v18 }
 0x308   : > { %v1943_v55 = vpop.permute.xlu1 %1942 }
 0x309   : > { %v2376_v39 = vsel %vm1063_vm6, %v2374_v19, %v1943_v55 }
 0x30c   : > { %v1977_v54 = vpop.permute.xlu1 %1976 }
 0x30d   : > { %v2379_v50 = vsel %vm2377_vm0, %v2376_v39, %v1977_v54 }
 0x310   : > { %v2011_v14 = vpop.permute.xlu1 %2010 }
 0x311   : > { %v2382_v41 = vsel %vm2380_vm1, %v2379_v50, %v2011_v14 }
 0x314   : > { %v2045_v49 = vpop.permute.xlu1 %2044 }
 0x315   : > { %v2385_v33 = vsel %vm2383_vm2, %v2382_v41, %v2045_v49 }
 0x316   : > { %v2388_v38 = vsel %vm2386_vm4, %v2385_v33, %v2079_v47 }
 0x317   : > { %v2391_v58 = vsel %vm2389_vm5, %v2388_v38, %v2129_v42 }
 0x318   : > { %v2394_v27 = vsel %vm2392_vm7, %v2391_v58, %v2163_v23  ;;  %v2299_v6 = vpop.permute.xlu1 %2298 }
 0x319   : > { %v2397_v13 = vsel %vm2395_vm8, %v2394_v27, %v2197_v1 }
 0x31a   : > { %v2400_v7 = vsel %vm2398_vm9, %v2397_v13, %v2231_v15 }
 0x31b   : > { %v2403_v44 = vsel %vm2401_vm10, %v2400_v7, %v2265_v34 }
 0x31c   : > { %v2406_v56 = vsel %vm2404_vm11, %v2403_v44, %v2299_v6  ;;  %v2333_v59 = vpop.permute.xlu1 %2332 }
 0x31d   : > { %v2409_v48 = vsel %vm2407_vm12, %v2406_v56, %v2333_v59 }
 0x320   : > { %v2367_v36 = vpop.permute.xlu1 %2366 }
 0x321   : > { %v2412_v61 = vsel %vm2410_vm13, %v2409_v48, %v2367_v36 }
 0x322   : > { %2414 = vst [vmem:[%s4720_s11 + $0x8] sm:$0xff] %v2412_v61 }
 0x323 PF: > { %s14_s17 = sadd.s32 1, %s2827_s17   ;;  %s4885_s15 = smov %s2823_s16 }
 0x324   : > { %p11_p5 = scmp.ge.s32.totalorder %s14_s17, 4   ;;  %s4886_s16 = smov %s4888_s18 }
 0x326   :  { %13 = sbr.rel (!%p11_p5) target bundleno = 2 (0x2), region = 67 }

</bundles_post_ra>
